<compile_context>
chip_gen: v5e
topology: v5e:2x2
jax: 0.10.0
libtpu: 0.0.40
codegen_flags: <defaults>
</compile_context>

<pallas_src>
import functools

import jax
import jax.numpy as jnp
from jax import lax
from jax.experimental import pallas as pl
from jax.experimental.pallas import tpu as pltpu


def _round_up(x, m):
    return ((x + m - 1) // m) * m


# ------------------------------ Pallas kernel -------------------------------

def _mha_kernel(x_ref, wqkv_ref, bqkv_ref, wproj_ref, bproj_ref,
                rpk_ref, rpv_ref, o_ref, *,
                scale, num_heads, head_dims, n_valid):
    """One batch element: fused qkv proj -> iRPE attention -> output proj."""
    H, D = num_heads, head_dims
    HD = H * D
    Np = x_ref.shape[0]
    # MXU operand dtype is decided by the wrapper (f32 or bf16); accumulation,
    # softmax and biases always stay f32.
    cdt = wqkv_ref.dtype

    # Fused q/k/v projection: one (Np, C) x (C, 3*H*D) MXU matmul, f32 accum.
    qkv = jnp.dot(x_ref[...], wqkv_ref[...],
                  preferred_element_type=jnp.float32) + bqkv_ref[...]

    # Fold the qk scale into q once (covers the QK term and the iRPE key
    # term), then split heads with static lane slices and materialize the
    # head-batched (H, Np, D) operands for the big matmuls.
    q_all = qkv[:, 0:HD] * scale
    q_parts = [q_all[:, h * D:(h + 1) * D] for h in range(H)]
    q_hnd = jnp.stack(q_parts, axis=0).astype(cdt)          # (H, Np, D)
    q_nhd = jnp.stack(q_parts, axis=1).astype(cdt)          # (Np, H, D)
    k_hnd = jnp.stack([qkv[:, HD + h * D:HD + (h + 1) * D] for h in range(H)],
                      axis=0).astype(cdt)                   # (H, Np, D)
    v_hnd = jnp.stack([qkv[:, 2 * HD + h * D:2 * HD + (h + 1) * D]
                       for h in range(H)], axis=0).astype(cdt)

    rpk = rpk_ref[...]                                      # (Np, Np, D)
    rpv = rpv_ref[...]                                      # (Np, Np, D)

    # QK^T for all heads at once: head-batched MXU matmul, f32 accumulation.
    s = jnp.einsum('hnd,hmd->hnm', q_hnd, k_hnd,
                   preferred_element_type=jnp.float32)      # (H, Np, Np)

    # iRPE key term: MXU dot_general batched over the query position n
    # (contract D); thin per-head slices do the (n,h,m)->(h,n,m) relayout.
    rel_k = jnp.einsum('nhd,nmd->nhm', q_nhd, rpk,
                       preferred_element_type=jnp.float32)  # (Np, H, Np)
    s = s + jnp.stack([rel_k[:, h, :] for h in range(H)], axis=0)

    # Key-padding: one additive bias (0 / -1e30) shared by all heads.
    # (-1e30 stays finite because s is f32.)  Skipped when N == Np.
    if n_valid < Np:
        col = lax.broadcasted_iota(jnp.int32, (1, 1, Np), 2)
        s = s + jnp.where(col < n_valid, 0.0, -1e30)

    # Softmax over the key (lane) axis in f32; exp + reciprocal run on the EUP.
    m = jnp.max(s, axis=-1, keepdims=True)
    e = jnp.exp(s - m)
    l = jnp.sum(e, axis=-1, keepdims=True)
    a = (e * pl.reciprocal(l, approx=True)).astype(cdt)     # (H, Np, Np)

    # attn @ V for all heads at once (head-batched MXU matmul, f32 accum).
    av = jnp.einsum('hnm,hmd->hnd', a, v_hnd,
                    preferred_element_type=jnp.float32)     # (H, Np, D)

    # iRPE value term: MXU dot_general batched over n (contract the key axis).
    a_nhm = jnp.stack([a[h] for h in range(H)], axis=1)     # (Np, H, Np)
    rel_v = jnp.einsum('nhm,nmd->nhd', a_nhm, rpv,
                       preferred_element_type=jnp.float32)  # (Np, H, D)

    # Merge heads back into the lane-dense (Np, H*D) layout.
    ctx = jnp.concatenate([av[h] + rel_v[:, h, :] for h in range(H)], axis=1)

    # Output projection; wproj/out are padded to a lane-dense width so the
    # final store is an unmasked vst (the wrapper slices back to embed_dims).
    o_ref[...] = (jnp.dot(ctx.astype(cdt), wproj_ref[...],
                          preferred_element_type=jnp.float32) + bproj_ref[...])
    # attn_drop / proj_drop / out_drop have rate 0.0 -> identity.
    # v_shortcut defaults to False.


# ------------------------- RelativePosition2D glue --------------------------

def rel_pos_2d_embed(table_v, table_h, N, max_rel):
    """Mirror RelativePosition2D.forward(N, N) -> (N, N, head_dims)."""
    L = N - 1
    sq = int(L ** 0.5)
    rng = jnp.arange(L)
    dv = rng[None, :] // sq - rng[:, None] // sq
    dh = rng[None, :] % sq - rng[:, None] % sq
    fv = jnp.clip(dv, -max_rel, max_rel) + max_rel + 1
    fh = jnp.clip(dh, -max_rel, max_rel) + max_rel + 1
    fv = jnp.pad(fv, ((1, 0), (1, 0)))   # constant 0 pad (the "cls" row/col)
    fh = jnp.pad(fh, ((1, 0), (1, 0)))
    return table_v[fv] + table_h[fh]


# --------------------- one-time parameter preparation -----------------------

def prepare_params(raw, *, use_bf16_mxu=False):
    """Hoisted out of the jit path: fuse qkv weights, pad the projection to a
    lane-dense width and (optionally) pre-cast the MXU operands to bf16.

    bf16 here only changes the MXU operand dtype; accumulation and the
    softmax stay f32, so it is safe on v5e (bf16 MXU, f32-only VPU/EUP) as
    well as v6e/v7x.  Biases stay f32.
    """
    cdt = jnp.bfloat16 if use_bf16_mxu else jnp.float32
    HD = raw["w_qs"].shape[1]
    E = raw["proj_w"].shape[1]
    E_pad = _round_up(E, 128)
    w_qkv = jnp.concatenate([raw["w_qs"], raw["w_ks"], raw["w_vs"]],
                            axis=1).astype(cdt)
    b_qkv = jnp.concatenate([raw["b_qs"], raw["b_ks"], raw["b_vs"]]
                            ).reshape(1, 3 * HD).astype(jnp.float32)
    proj_w = jnp.pad(raw["proj_w"], ((0, 0), (0, E_pad - E))).astype(cdt)
    proj_b = jnp.pad(raw["proj_b"], (0, E_pad - E)).reshape(
        1, E_pad).astype(jnp.float32)
    return dict(
        w_qkv=w_qkv, b_qkv=b_qkv, proj_w=proj_w, proj_b=proj_b,
        rpk_v=raw["rpk_v"].astype(cdt), rpk_h=raw["rpk_h"].astype(cdt),
        rpv_v=raw["rpv_v"].astype(cdt), rpv_h=raw["rpv_h"].astype(cdt))


# ------------------------------- full forward --------------------------------

@functools.partial(
    jax.jit,
    static_argnames=("num_heads", "head_dims", "embed_dims",
                     "max_relative_position", "qk_scale", "use_bf16_mxu"))
def multihead_attention_forward(x, params, *, num_heads, embed_dims,
                                head_dims=64, max_relative_position=14,
                                qk_scale=None, use_bf16_mxu=False):
    B, N, C = x.shape
    H, D = num_heads, head_dims
    HD = H * D
    E_pad = params["proj_w"].shape[1]
    cdt = jnp.bfloat16 if use_bf16_mxu else jnp.float32
    scale = qk_scale or head_dims ** (-0.5)

    # Token-axis padding: sublane multiple (8) for tiny N, lane multiple (128)
    # for ViT-scale N so the softmax reductions and the attn@V contraction run
    # on unmasked lane-dense tiles.  Padded keys are masked inside the kernel
    # and padded query rows are sliced off below.
    Np = _round_up(N, 128) if N >= 64 else _round_up(N, 8)
    x_p = jnp.pad(x, ((0, 0), (0, Np - N), (0, 0))).astype(cdt)

    # iRPE embedding tensors (tiny, shape-static plain-JAX glue), padded to Np.
    rpk = rel_pos_2d_embed(params["rpk_v"], params["rpk_h"], N,
                           max_relative_position)
    rpv = rel_pos_2d_embed(params["rpv_v"], params["rpv_h"], N,
                           max_relative_position)
    rpk = jnp.pad(rpk, ((0, Np - N), (0, Np - N), (0, 0)))
    rpv = jnp.pad(rpv, ((0, Np - N), (0, Np - N), (0, 0)))
    # TODO(synk): for ViT-scale N switch to the factorized iRPE form
    # (q @ table^T plus bucketed gathers / attn bucket-sums) so these
    # O(N^2*D) tensors never exist, and tile the query axis
    # (grid=(B, Np // TQ)) to stay inside v7x's 64 MiB VMEM.

    isz = 2 if use_bf16_mxu else 4
    # VMEM budget: pipelined buffers (invariants single-buffered via
    # Buffered(1)) plus the in-kernel working set, with ~1.5x headroom;
    # floored at the 32 MiB default scoped limit so small shapes see no
    # change.  (On v7x keep this <= 64 MiB; the query-tiling TODO above is
    # the real fix there.)
    buf_bytes = (2 * Np * C * isz                        # x (double-buffered)
                 + C * 3 * HD * isz + 3 * HD * 4         # w_qkv / b_qkv
                 + HD * E_pad * isz + E_pad * 4          # proj_w / proj_b
                 + 2 * Np * Np * D * isz                 # rpk + rpv (1 buffer)
                 + 2 * Np * E_pad * 4)                   # out (double-buffered)
    work_bytes = (Np * 3 * HD * 4 + 5 * Np * H * D * 4
                  + 6 * H * Np * Np * 4 + Np * HD * 4)
    vmem_limit = int(min(max(1.5 * (buf_bytes + work_bytes), 32 * 2 ** 20),
                         128 * 2 ** 20))

    flops = 2 * B * (Np * C * 3 * HD                     # qkv projection
                     + 2 * H * Np * Np * D               # QK^T and attn@V
                     + 2 * Np * H * Np * D               # iRPE key/value terms
                     + Np * HD * E_pad)                  # output projection
    cost = pl.CostEstimate(
        flops=flops,
        transcendentals=B * H * Np * Np,
        bytes_accessed=(B * Np * C * isz + C * 3 * HD * isz + HD * E_pad * isz
                        + 2 * Np * Np * D * isz + B * Np * E_pad * 4
                        + 3 * HD * 4 + E_pad * 4))

    kern = functools.partial(_mha_kernel, scale=scale, num_heads=H,
                             head_dims=D, n_valid=N)

    def _invariant(shape):
        # Constant index_map -> DMA'd once and kept resident; a single
        # pipeline buffer (default double-buffering is pure VMEM waste here).
        return pl.BlockSpec(shape, lambda b: (0,) * len(shape),
                            pipeline_mode=pl.Buffered(1))

    out = pl.pallas_call(
        kern,
        out_shape=jax.ShapeDtypeStruct((B, Np, E_pad), jnp.float32),
        grid=(B,),
        in_specs=[
            pl.BlockSpec((None, Np, C), lambda b: (b, 0, 0)),    # x
            _invariant((C, 3 * HD)),                             # w_qkv
            _invariant((1, 3 * HD)),                             # b_qkv
            _invariant((HD, E_pad)),                             # proj_w
            _invariant((1, E_pad)),                              # proj_b
            _invariant((Np, Np, D)),                             # rpk
            _invariant((Np, Np, D)),                             # rpv
        ],
        out_specs=pl.BlockSpec((None, Np, E_pad), lambda b: (b, 0, 0)),
        compiler_params=pltpu.CompilerParams(
            dimension_semantics=("parallel",),
            vmem_limit_bytes=vmem_limit),
        cost_estimate=cost,
    )(x_p, params["w_qkv"], params["b_qkv"], params["proj_w"],
      params["proj_b"], rpk, rpv)

    return out[:, :N, :embed_dims]


# ------------------------- pure-JAX reference check --------------------------

def reference_forward(x, params, *, num_heads, head_dims=64,
                      max_relative_position=14, qk_scale=None):
    B, N, C = x.shape
    scale = qk_scale or head_dims ** (-0.5)
    q = (x @ params["w_qs"] + params["b_qs"]).reshape(B, N, num_heads, head_dims)
    k = (x @ params["w_ks"] + params["b_ks"]).reshape(B, N, num_heads, head_dims)
    v = (x @ params["w_vs"] + params["b_vs"]).reshape(B, N, num_heads, head_dims)
    q, k, v = (t.transpose(0, 2, 1, 3) for t in (q, k, v))
    attn = jnp.einsum("bhnd,bhmd->bhnm", q, k) * scale
    rpk = rel_pos_2d_embed(params["rpk_v"], params["rpk_h"], N,
                           max_relative_position)
    attn = attn + jnp.einsum("bhnd,nmd->bhnm", q, rpk) * scale
    attn = jax.nn.softmax(attn, axis=-1)
    out = jnp.einsum("bhnm,bhmd->bhnd", attn, v)
    rpv = rel_pos_2d_embed(params["rpv_v"], params["rpv_h"], N,
                           max_relative_position)
    out = out + jnp.einsum("bhnm,nmd->bhnd", attn, rpv)
    out = out.transpose(0, 2, 1, 3).reshape(B, N, num_heads * head_dims)
    return out @ params["proj_w"] + params["proj_b"]


# ----------------------------------- main ------------------------------------

if __name__ == "__main__":
    # Small config: embed_dims = input_dims = 32, num_heads = 2 (head_dims is
    # hard-coded to 64 in the PyTorch module), N = 17 tokens
    # (1 cls token + 4x4 patches, so RelativePosition2D sees length 16).
    B, N = 2, 17
    embed_dims = 32
    input_dims = embed_dims
    num_heads = 2
    head_dims = 64
    qkv_dims = num_heads * head_dims
    max_rel = 14
    table_rows = max_rel * 2 + 2

    key = jax.random.PRNGKey(0)
    ks = jax.random.split(key, 14)

    def lin_init(kw, kb, cin, cout):
        w = jax.random.normal(kw, (cin, cout), jnp.float32) * 0.02
        b = jax.random.normal(kb, (cout,), jnp.float32) * 0.02
        return w, b

    w_qs, b_qs = lin_init(ks[0], ks[1], input_dims, qkv_dims)
    w_ks, b_ks = lin_init(ks[2], ks[3], input_dims, qkv_dims)
    w_vs, b_vs = lin_init(ks[4], ks[5], input_dims, qkv_dims)
    proj_w, proj_b = lin_init(ks[6], ks[7], qkv_dims, embed_dims)

    def trunc(k):
        return 0.02 * jax.random.truncated_normal(
            k, -2.0, 2.0, (table_rows, head_dims), jnp.float32)

    raw_params = dict(
        w_qs=w_qs, b_qs=b_qs,
        w_ks=w_ks, b_ks=b_ks,
        w_vs=w_vs, b_vs=b_vs,
        proj_w=proj_w, proj_b=proj_b,
        rpk_v=trunc(ks[8]), rpk_h=trunc(ks[9]),
        rpv_v=trunc(ks[10]), rpv_h=trunc(ks[11]),
    )

    x = jax.random.normal(ks[12], (B, N, input_dims), jnp.float32)

    # One-time weight fusion / padding (set use_bf16_mxu=True for v5e/v6e/v7x
    # throughput; f32 here for tight parity with the f32 PyTorch module).
    fused_params = prepare_params(raw_params, use_bf16_mxu=False)

    out = multihead_attention_forward(
        x, fused_params, num_heads=num_heads, embed_dims=embed_dims,
        head_dims=head_dims, max_relative_position=max_rel)
    out = jax.block_until_ready(out)

    ref = reference_forward(
        x, raw_params, num_heads=num_heads, head_dims=head_dims,
        max_relative_position=max_rel)

    assert out.shape == (B, N, embed_dims), out.shape
    assert jnp.allclose(out, ref, atol=5e-4, rtol=5e-4), (
        float(jnp.max(jnp.abs(out - ref))))

    print("KERNEL_OK")
</pallas_src>

<mosaic_0001>
module attributes {stable_mosaic.version = 11 : i64} {
  func.func @_mha_kernel(%arg0: i32, %arg1: memref<1x24x32xf32, #tpu.memory_space<vmem>>, %arg2: memref<32x384xf32, #tpu.memory_space<vmem>>, %arg3: memref<1x384xf32, #tpu.memory_space<vmem>>, %arg4: memref<128x128xf32, #tpu.memory_space<vmem>>, %arg5: memref<1x128xf32, #tpu.memory_space<vmem>>, %arg6: memref<24x24x64xf32, #tpu.memory_space<vmem>>, %arg7: memref<24x24x64xf32, #tpu.memory_space<vmem>>, %arg8: memref<1x24x128xf32, #tpu.memory_space<vmem>>) attributes {dimension_semantics = [#tpu.dimension_semantics<parallel>], iteration_bounds = array<i64: 2>, scalar_prefetch = 0 : i64, scratch_operands = 0 : i64, tpu.core_type = #tpu.core_type<tc>, window_params = [{transform_indices = @transform_0, window_bounds = array<i64: 1, 24, 32>}, {pipeline_mode = #tpu.pipeline_mode<synchronous>, transform_indices = @transform_1, window_bounds = array<i64: 32, 384>}, {pipeline_mode = #tpu.pipeline_mode<synchronous>, transform_indices = @transform_2, window_bounds = array<i64: 1, 384>}, {pipeline_mode = #tpu.pipeline_mode<synchronous>, transform_indices = @transform_3, window_bounds = array<i64: 128, 128>}, {pipeline_mode = #tpu.pipeline_mode<synchronous>, transform_indices = @transform_4, window_bounds = array<i64: 1, 128>}, {pipeline_mode = #tpu.pipeline_mode<synchronous>, transform_indices = @transform_5, window_bounds = array<i64: 24, 24, 64>}, {pipeline_mode = #tpu.pipeline_mode<synchronous>, transform_indices = @transform_6, window_bounds = array<i64: 24, 24, 64>}, {transform_indices = @transform_7, window_bounds = array<i64: 1, 24, 128>}]} {
    %c0 = arith.constant 0 : index
    %c0_0 = arith.constant 0 : index
    %c0_1 = arith.constant 0 : index
    %0 = vector.load %arg1[%c0, %c0_0, %c0_1] : memref<1x24x32xf32, #tpu.memory_space<vmem>>, vector<1x24x32xf32>
    %1 = vector.shape_cast %0 : vector<1x24x32xf32> to vector<24x32xf32>
    %c0_2 = arith.constant 0 : index
    %c0_3 = arith.constant 0 : index
    %2 = vector.load %arg2[%c0_2, %c0_3] : memref<32x384xf32, #tpu.memory_space<vmem>>, vector<32x384xf32>
    %cst = arith.constant dense<0.000000e+00> : vector<24x384xf32>
    %3 = tpu.matmul %1, %2, %cst {dimension_numbers = #tpu.dot_dimension_numbers<[1], [0], [0], [1], [0, 0, 1, 1], [], []>} : vector<24x32xf32>, vector<32x384xf32>, vector<24x384xf32> -> vector<24x384xf32>
    %c0_4 = arith.constant 0 : index
    %c0_5 = arith.constant 0 : index
    %4 = vector.load %arg3[%c0_4, %c0_5] : memref<1x384xf32, #tpu.memory_space<vmem>>, vector<1x384xf32>
    %5 = vector.broadcast %4 : vector<1x384xf32> to vector<24x384xf32>
    %6 = arith.addf %3, %5 : vector<24x384xf32>
    %7 = vector.extract_strided_slice %6 {offsets = [0, 0], sizes = [24, 128], strides = [1, 1]} : vector<24x384xf32> to vector<24x128xf32>
    %cst_6 = arith.constant 1.250000e-01 : f32
    %8 = vector.broadcast %cst_6 : f32 to vector<24x128xf32>
    %9 = arith.mulf %7, %8 : vector<24x128xf32>
    %10 = vector.extract_strided_slice %9 {offsets = [0, 0], sizes = [24, 64], strides = [1, 1]} : vector<24x128xf32> to vector<24x64xf32>
    %11 = vector.extract_strided_slice %9 {offsets = [0, 64], sizes = [24, 64], strides = [1, 1]} : vector<24x128xf32> to vector<24x64xf32>
    %12 = vector.shape_cast %10 : vector<24x64xf32> to vector<1x24x64xf32>
    %13 = vector.shape_cast %11 : vector<24x64xf32> to vector<1x24x64xf32>
    %14 = tpu.concatenate %12, %13 in 0 : vector<1x24x64xf32>, vector<1x24x64xf32> -> vector<2x24x64xf32>
    %15 = vector.shape_cast %10 : vector<24x64xf32> to vector<24x1x64xf32>
    %16 = vector.shape_cast %11 : vector<24x64xf32> to vector<24x1x64xf32>
    %17 = tpu.concatenate %15, %16 in 1 : vector<24x1x64xf32>, vector<24x1x64xf32> -> vector<24x2x64xf32>
    %18 = vector.extract_strided_slice %6 {offsets = [0, 128], sizes = [24, 64], strides = [1, 1]} : vector<24x384xf32> to vector<24x64xf32>
    %19 = vector.extract_strided_slice %6 {offsets = [0, 192], sizes = [24, 64], strides = [1, 1]} : vector<24x384xf32> to vector<24x64xf32>
    %20 = vector.shape_cast %18 : vector<24x64xf32> to vector<1x24x64xf32>
    %21 = vector.shape_cast %19 : vector<24x64xf32> to vector<1x24x64xf32>
    %22 = tpu.concatenate %20, %21 in 0 : vector<1x24x64xf32>, vector<1x24x64xf32> -> vector<2x24x64xf32>
    %23 = vector.extract_strided_slice %6 {offsets = [0, 256], sizes = [24, 64], strides = [1, 1]} : vector<24x384xf32> to vector<24x64xf32>
    %24 = vector.extract_strided_slice %6 {offsets = [0, 320], sizes = [24, 64], strides = [1, 1]} : vector<24x384xf32> to vector<24x64xf32>
    %25 = vector.shape_cast %23 : vector<24x64xf32> to vector<1x24x64xf32>
    %26 = vector.shape_cast %24 : vector<24x64xf32> to vector<1x24x64xf32>
    %27 = tpu.concatenate %25, %26 in 0 : vector<1x24x64xf32>, vector<1x24x64xf32> -> vector<2x24x64xf32>
    %c0_7 = arith.constant 0 : index
    %c0_8 = arith.constant 0 : index
    %c0_9 = arith.constant 0 : index
    %28 = vector.load %arg6[%c0_7, %c0_8, %c0_9] : memref<24x24x64xf32, #tpu.memory_space<vmem>>, vector<24x24x64xf32>
    %c0_10 = arith.constant 0 : index
    %c0_11 = arith.constant 0 : index
    %c0_12 = arith.constant 0 : index
    %29 = vector.load %arg7[%c0_10, %c0_11, %c0_12] : memref<24x24x64xf32, #tpu.memory_space<vmem>>, vector<24x24x64xf32>
    "tpu.trace_start"() <{level = 10 : i32, message = "hnd,hmd->hnm"}> : () -> ()
    %cst_13 = arith.constant dense<0.000000e+00> : vector<2x24x24xf32>
    %30 = tpu.matmul %14, %22, %cst_13 {dimension_numbers = #tpu.dot_dimension_numbers<[2], [2], [1], [1], [0, 0, 0, 1, 1, 1], [0], [0]>} : vector<2x24x64xf32>, vector<2x24x64xf32>, vector<2x24x24xf32> -> vector<2x24x24xf32>
    "tpu.trace_stop"() : () -> ()
    "tpu.trace_start"() <{level = 10 : i32, message = "nhd,nmd->nhm"}> : () -> ()
    %cst_14 = arith.constant dense<0.000000e+00> : vector<24x2x24xf32>
    %31 = tpu.matmul %17, %28, %cst_14 {dimension_numbers = #tpu.dot_dimension_numbers<[2], [2], [1], [1], [0, 0, 0, 1, 1, 1], [0], [0]>} : vector<24x2x64xf32>, vector<24x24x64xf32>, vector<24x2x24xf32> -> vector<24x2x24xf32>
    "tpu.trace_stop"() : () -> ()
    %32 = vector.extract_strided_slice %31 {offsets = [0, 0, 0], sizes = [24, 1, 24], strides = [1, 1, 1]} : vector<24x2x24xf32> to vector<24x1x24xf32>
    %33 = vector.shape_cast %32 : vector<24x1x24xf32> to vector<24x24xf32>
    %34 = vector.extract_strided_slice %31 {offsets = [0, 1, 0], sizes = [24, 1, 24], strides = [1, 1, 1]} : vector<24x2x24xf32> to vector<24x1x24xf32>
    %35 = vector.shape_cast %34 : vector<24x1x24xf32> to vector<24x24xf32>
    %36 = vector.shape_cast %33 : vector<24x24xf32> to vector<1x24x24xf32>
    %37 = vector.shape_cast %35 : vector<24x24xf32> to vector<1x24x24xf32>
    %38 = tpu.concatenate %36, %37 in 0 : vector<1x24x24xf32>, vector<1x24x24xf32> -> vector<2x24x24xf32>
    %39 = arith.addf %30, %38 : vector<2x24x24xf32>
    %40 = tpu.iota {dimensions = array<i32: 2>} : vector<1x1x24xi32>
    %c17_i32 = arith.constant 17 : i32
    %41 = vector.broadcast %c17_i32 : i32 to vector<1x1x24xi32>
    %42 = arith.cmpi slt, %40, %41 : vector<1x1x24xi32>
    %cst_15 = arith.constant 0.000000e+00 : f32
    %cst_16 = arith.constant -1.000000e+30 : f32
    %43 = vector.broadcast %cst_15 : f32 to vector<1x1x24xf32>
    %44 = vector.broadcast %cst_16 : f32 to vector<1x1x24xf32>
    %45 = arith.select %42, %43, %44 : vector<1x1x24xi1>, vector<1x1x24xf32>
    %46 = vector.broadcast %45 : vector<1x1x24xf32> to vector<2x24x24xf32>
    %47 = arith.addf %39, %46 : vector<2x24x24xf32>
    %cst_17 = arith.constant dense<0xFF800000> : vector<2x24xf32>
    %48 = vector.multi_reduction <maximumf>, %47, %cst_17 [2] : vector<2x24x24xf32> to vector<2x24xf32>
    %49 = vector.shape_cast %48 : vector<2x24xf32> to vector<2x24x1xf32>
    %50 = vector.broadcast %49 : vector<2x24x1xf32> to vector<2x24x24xf32>
    %51 = arith.subf %47, %50 : vector<2x24x24xf32>
    %52 = math.exp %51 : vector<2x24x24xf32>
    %cst_18 = arith.constant dense<0.000000e+00> : vector<2x24xf32>
    %53 = vector.multi_reduction <add>, %52, %cst_18 [2] : vector<2x24x24xf32> to vector<2x24xf32>
    %54 = vector.shape_cast %53 : vector<2x24xf32> to vector<2x24x1xf32>
    %55 = tpu.reciprocal %54 {approx = true} : vector<2x24x1xf32> -> vector<2x24x1xf32>
    %56 = vector.broadcast %55 : vector<2x24x1xf32> to vector<2x24x24xf32>
    %57 = arith.mulf %52, %56 : vector<2x24x24xf32>
    "tpu.trace_start"() <{level = 10 : i32, message = "hnm,hmd->hnd"}> : () -> ()
    %cst_19 = arith.constant dense<0.000000e+00> : vector<2x24x64xf32>
    %58 = tpu.matmul %57, %27, %cst_19 {dimension_numbers = #tpu.dot_dimension_numbers<[2], [1], [1], [2], [0, 0, 0, 1, 1, 2], [0], [0]>} : vector<2x24x24xf32>, vector<2x24x64xf32>, vector<2x24x64xf32> -> vector<2x24x64xf32>
    "tpu.trace_stop"() : () -> ()
    %59 = vector.extract_strided_slice %57 {offsets = [0, 0, 0], sizes = [1, 24, 24], strides = [1, 1, 1]} : vector<2x24x24xf32> to vector<1x24x24xf32>
    %60 = vector.shape_cast %59 : vector<1x24x24xf32> to vector<24x24xf32>
    %61 = vector.extract_strided_slice %57 {offsets = [1, 0, 0], sizes = [1, 24, 24], strides = [1, 1, 1]} : vector<2x24x24xf32> to vector<1x24x24xf32>
    %62 = vector.shape_cast %61 : vector<1x24x24xf32> to vector<24x24xf32>
    %63 = vector.shape_cast %60 : vector<24x24xf32> to vector<24x1x24xf32>
    %64 = vector.shape_cast %62 : vector<24x24xf32> to vector<24x1x24xf32>
    %65 = tpu.concatenate %63, %64 in 1 : vector<24x1x24xf32>, vector<24x1x24xf32> -> vector<24x2x24xf32>
    "tpu.trace_start"() <{level = 10 : i32, message = "nhm,nmd->nhd"}> : () -> ()
    %cst_20 = arith.constant dense<0.000000e+00> : vector<24x2x64xf32>
    %66 = tpu.matmul %65, %29, %cst_20 {dimension_numbers = #tpu.dot_dimension_numbers<[2], [1], [1], [2], [0, 0, 0, 1, 1, 2], [0], [0]>} : vector<24x2x24xf32>, vector<24x24x64xf32>, vector<24x2x64xf32> -> vector<24x2x64xf32>
    "tpu.trace_stop"() : () -> ()
    %67 = vector.extract_strided_slice %58 {offsets = [0, 0, 0], sizes = [1, 24, 64], strides = [1, 1, 1]} : vector<2x24x64xf32> to vector<1x24x64xf32>
    %68 = vector.shape_cast %67 : vector<1x24x64xf32> to vector<24x64xf32>
    %69 = vector.extract_strided_slice %66 {offsets = [0, 0, 0], sizes = [24, 1, 64], strides = [1, 1, 1]} : vector<24x2x64xf32> to vector<24x1x64xf32>
    %70 = vector.shape_cast %69 : vector<24x1x64xf32> to vector<24x64xf32>
    %71 = arith.addf %68, %70 : vector<24x64xf32>
    %72 = vector.extract_strided_slice %58 {offsets = [1, 0, 0], sizes = [1, 24, 64], strides = [1, 1, 1]} : vector<2x24x64xf32> to vector<1x24x64xf32>
    %73 = vector.shape_cast %72 : vector<1x24x64xf32> to vector<24x64xf32>
    %74 = vector.extract_strided_slice %66 {offsets = [0, 1, 0], sizes = [24, 1, 64], strides = [1, 1, 1]} : vector<24x2x64xf32> to vector<24x1x64xf32>
    %75 = vector.shape_cast %74 : vector<24x1x64xf32> to vector<24x64xf32>
    %76 = arith.addf %73, %75 : vector<24x64xf32>
    %77 = tpu.concatenate %71, %76 in 1 : vector<24x64xf32>, vector<24x64xf32> -> vector<24x128xf32>
    %c0_21 = arith.constant 0 : index
    %c0_22 = arith.constant 0 : index
    %78 = vector.load %arg4[%c0_21, %c0_22] : memref<128x128xf32, #tpu.memory_space<vmem>>, vector<128x128xf32>
    %cst_23 = arith.constant dense<0.000000e+00> : vector<24x128xf32>
    %79 = tpu.matmul %77, %78, %cst_23 {dimension_numbers = #tpu.dot_dimension_numbers<[1], [0], [0], [1], [0, 0, 1, 1], [], []>} : vector<24x128xf32>, vector<128x128xf32>, vector<24x128xf32> -> vector<24x128xf32>
    %c0_24 = arith.constant 0 : index
    %c0_25 = arith.constant 0 : index
    %80 = vector.load %arg5[%c0_24, %c0_25] : memref<1x128xf32, #tpu.memory_space<vmem>>, vector<1x128xf32>
    %81 = vector.broadcast %80 : vector<1x128xf32> to vector<24x128xf32>
    %82 = arith.addf %79, %81 : vector<24x128xf32>
    %c0_26 = arith.constant 0 : index
    %c0_27 = arith.constant 0 : index
    %c0_28 = arith.constant 0 : index
    %83 = vector.load %arg8[%c0_26, %c0_27, %c0_28] : memref<1x24x128xf32, #tpu.memory_space<vmem>>, vector<1x24x128xf32>
    %84 = vector.shape_cast %83 : vector<1x24x128xf32> to vector<24x128xf32>
    %85 = vector.shape_cast %82 : vector<24x128xf32> to vector<1x24x128xf32>
    tpu.vector_store %arg8[%c0_26, %c0_27, %c0_28], %85 {strides = array<i32>} : memref<1x24x128xf32, #tpu.memory_space<vmem>>, vector<1x24x128xf32>,
    return
  }
  func.func @transform_0(%arg0: i32) -> (i32, i32, i32) {
    %c0_i32 = arith.constant 0 : i32
    %c0_i32_0 = arith.constant 0 : i32
    %c0_i32_1 = arith.constant 0 : i32
    return %arg0, %c0_i32, %c0_i32_0 : i32, i32, i32
  }
  func.func @transform_1(%arg0: i32) -> (i32, i32) {
    %c0_i32 = arith.constant 0 : i32
    %c0_i32_0 = arith.constant 0 : i32
    %c0_i32_1 = arith.constant 0 : i32
    return %c0_i32, %c0_i32_0 : i32, i32
  }
  func.func @transform_2(%arg0: i32) -> (i32, i32) {
    %c0_i32 = arith.constant 0 : i32
    %c0_i32_0 = arith.constant 0 : i32
    %c0_i32_1 = arith.constant 0 : i32
    return %c0_i32, %c0_i32_0 : i32, i32
  }
  func.func @transform_3(%arg0: i32) -> (i32, i32) {
    %c0_i32 = arith.constant 0 : i32
    %c0_i32_0 = arith.constant 0 : i32
    %c0_i32_1 = arith.constant 0 : i32
    return %c0_i32, %c0_i32_0 : i32, i32
  }
  func.func @transform_4(%arg0: i32) -> (i32, i32) {
    %c0_i32 = arith.constant 0 : i32
    %c0_i32_0 = arith.constant 0 : i32
    %c0_i32_1 = arith.constant 0 : i32
    return %c0_i32, %c0_i32_0 : i32, i32
  }
  func.func @transform_5(%arg0: i32) -> (i32, i32, i32) {
    %c0_i32 = arith.constant 0 : i32
    %c0_i32_0 = arith.constant 0 : i32
    %c0_i32_1 = arith.constant 0 : i32
    %c0_i32_2 = arith.constant 0 : i32
    return %c0_i32, %c0_i32_0, %c0_i32_1 : i32, i32, i32
  }
  func.func @transform_6(%arg0: i32) -> (i32, i32, i32) {
    %c0_i32 = arith.constant 0 : i32
    %c0_i32_0 = arith.constant 0 : i32
    %c0_i32_1 = arith.constant 0 : i32
    %c0_i32_2 = arith.constant 0 : i32
    return %c0_i32, %c0_i32_0, %c0_i32_1 : i32, i32, i32
  }
  func.func @transform_7(%arg0: i32) -> (i32, i32, i32) {
    %c0_i32 = arith.constant 0 : i32
    %c0_i32_0 = arith.constant 0 : i32
    %c0_i32_1 = arith.constant 0 : i32
    return %arg0, %c0_i32, %c0_i32_0 : i32, i32, i32
  }
}

</mosaic_0001>

<bundles_post_ra>
// kernel: multihead_attention_forward.1
= control target key start
LH: loop header
LB: loop body
LE: loop exit
PB: predicated region body
PF: predicated region fallthrough
CT: control target
= control target key end

     0   :  { %s3055_s24 = smov 0   ;;  %s4280_s0 = inlined_call_operand.vmem [shape: f32[2,24,32], index: 0, kind: input, shape index: {}]   ;;  %s4281_s1 = inlined_call_operand.vmem [shape: f32[32,384], index: 1, kind: input, shape index: {}]   ;;  %s4282_s2 = inlined_call_operand.vmem [shape: f32[1,384], index: 2, kind: input, shape index: {}]   ;;  %s4283_s3 = inlined_call_operand.vmem [shape: f32[128,128], index: 3, kind: input, shape index: {}]   ;;  %s4284_s4 = inlined_call_operand.vmem [shape: f32[1,128], index: 4, kind: input, shape index: {}]   ;;  %s4285_s5 = inlined_call_operand.vmem [shape: f32[24,24,64], index: 5, kind: input, shape index: {}]   ;;  %s4286_s6 = inlined_call_operand.vmem [shape: f32[24,24,64], index: 6, kind: input, shape index: {}]   ;;  %s4287_s7 = inlined_call_operand.vmem [shape: f32[2,24,128], index: 7, kind: output, shape index: {}]  }
   0x1 LB: > { %s2790_s25 = sadd.s32 4294967295, %s3011_s24   ;;  %p2794_p0 = scmp.ge.s32.totalorder %s3011_s24, 1  ;;  %s3011_s24 = sphi %s3055_s24, %s17_s24  }
   0x2   : > { %p237_p1 = scmp.lt.s32.totalorder %s3011_s24, 3 }
   0x4   : > { %p238_p2 = pnand %p2794_p0, %p237_p1 }
   0x5   : > { %p269_p3 = scmp.lt.s32.totalorder (!%p238_p2), %s2790_s25, 1  ;;  %s3013_s27 = smov (!%p238_p2), 64  }
   0x6   : > { %241 = sbr.rel (%p238_p2) target bundleno = 1193 (0x4a9), region = 48 }
   0xb   : > { %v291_v0 = vld [vmem:[%s4281_s1 + $0x48] sm:$0xff]  ;;  %v288_v1 = vld [vmem:[%s4281_s1 + $0x30] sm:$0xff]  ;;  %v289_v3 = vld [vmem:[%s4281_s1 + $0x38] sm:$0xff]  ;;  %s4289_s25 = smov (!%p269_p3, %s2790_s25), 1  ;;  %vm302_vm0 = vcmask 261120   ;;  %vm730_vm1 = vcmask 523264  }
   0xc   : > { %324 = vmatpush.msra.mxu0 %v291_v0  ;;  %v292_v2 = vld [vmem:[%s4281_s1 + $0x50] sm:$0xff]  ;;  %v285_v4 = vld [vmem:[%s4281_s1 + $0x18] sm:$0xff]  ;;  %v286_v5 = vld [vmem:[%s4281_s1 + $0x20] sm:$0xff]  ;;  %s2964_s17 = smul.u32 24, %s4289_s25  ;;  %vm540_vm2 = vcmask 1040384   ;;  %vm1548_vm3 = vcmask 1041409  }
   0xd   : > { %350 = vmatpush.msra.mxu1 %v292_v2  ;;  %v282_v6 = vld [vmem:[%s4281_s1] sm:$0xff]  ;;  %v283_v7 = vld [vmem:[%s4281_s1 + $0x8] sm:$0xff]  ;;  %v293_v59 = vld [vmem:[%s4281_s1 + $0x58] sm:$0xff]  ;;  %vm1551_vm4 = vcmask 1042434   ;;  %vm1554_vm5 = vcmask 1043459   ;;  %vm1557_vm6 = vcmask 1044484  }
   0xe   : > { %325 = vmatpush.msra.mxu0 %v288_v1  ;;  %s273_s22 = scalar_lea.vmem %s4280_s0, %s2964_s17  ;;  %v3116_v11 = vld [vmem:[%s4282_s2] sm:$0x7]  ;;  %376 = vmatpush.msra.mxu3 %v293_v59  ;;  %v287_v62 = vld [vmem:[%s4281_s1 + $0x28] sm:$0xff]  ;;  %v593_v63 = vld [vmem:[%s4285_s5 + $0x38] sm:$0xff]  ;;  %vm1560_vm7 = vcmask 1045509   ;;  %vm1563_vm8 = vcmask 1046534   ;;  %s278_s13 = scalar_lea.vmem %s4287_s7, %s2964_s17 }
   0xf   : > { %351 = vmatpush.msra.mxu1 %v289_v3  ;;  %v3095_v8 = vld [vmem:[%s273_s22] sm:$0xff]  ;;  %v3101_v9 = vld [vmem:[%s273_s22 + $0x8] sm:$0xff]  ;;  %v3107_v10 = vld [vmem:[%s273_s22 + $0x10] sm:$0xff]  ;;  %v296_v12 = vperm.slane %v3116_v11, 0  ;;  %v297_v40 = vperm.slane %v3116_v11, 1  ;;  %vm1565_vm9 = vcmask 1047559  }
  0x10   : > { %326 = vmatpush.msra.mxu0 %v285_v4  ;;  %v594_v60 = vld [vmem:[%s4285_s5 + $0x40] sm:$0xff]  ;;  %v284_v2 = vld [vmem:[%s4281_s1 + $0x10] sm:$0xff]  ;;  %vm1727_vm11 = vcmask 195584  }
  0x11   : > { %352 = vmatpush.msra.mxu1 %v286_v5  ;;  %v290_v61 = vld [vmem:[%s4281_s1 + $0x40] sm:$0xff]  ;;  %v592_v4 = vld [vmem:[%s4285_s5 + $0x30] sm:$0xff] }
  0x12   : > { %327 = vmatpush.msra.mxu0 %v282_v6  ;;  %377 = vmatpush.msra.mxu3 %v290_v61  ;;  %v600_v5 = vld [vmem:[%s4285_s5 + $0x70] sm:$0xff] }
  0x13   : > { %2797 = vmatmul.msk.f32.vlgmr.msra.gmra.mxu0 %vm302_vm0, %v3095_v8  ;;  %353 = vmatpush.msra.mxu1 %v283_v7 }
  0x14   : > { %2800 = vmatmul.msk.f32.vlgmr.msra.gmra.mxu1 %vm302_vm0, %v3095_v8  ;;  %2814 = vmatpush.xpose.msk.msrb.mxu0 %vm730_vm1, %v594_v60  ;;  %v604_v60 = vld [vmem:[%s4285_s5 + $0x90] sm:$0xff] }
  0x15   : > { %378 = vmatpush.msra.mxu3 %v287_v62  ;;  %v618_v62 = vld [vmem:[%s4285_s5 + $0x100] sm:$0xff] }
  0x17   : > { %379 = vmatpush.msra.mxu3 %v284_v2 }
  0x18   : > { %2815 = vmatpush.xpose.msk.msrb.mxu0 %vm730_vm1, %v593_v63  ;;  %2803 = vmatmul.msk.f32.vlgmr.msra.gmra.mxu3 %vm302_vm0, %v3095_v8  ;;  %v623_v63 = vld [vmem:[%s4285_s5 + $0x128] sm:$0xff] }
  0x1b   : > { %2798 = vmatmul.msk.f32.gmra.mxu0 %vm302_vm0, %v3101_v9 }
  0x1c   : > { %2801 = vmatmul.msk.f32.gmra.mxu1 %vm302_vm0, %v3101_v9  ;;  %2816 = vmatpush.xpose.msk.msrb.mxu0 %vm730_vm1, %v592_v4  ;;  %v616_v4 = vld [vmem:[%s4285_s5 + $0xf0] sm:$0xff] }
  0x20   : > { %2822 = vmatpush.xpose.msk.msra.mxu0 %vm730_vm1, %v600_v5  ;;  %2804 = vmatmul.msk.f32.gmra.mxu3 %vm302_vm0, %v3101_v9 }
  0x23   : > { %2799 = vmatmul.msk.f32.gmra.mxu0 %vm302_vm0, %v3107_v10 }
  0x24   : > { %2802 = vmatmul.msk.f32.gmra.mxu1 %vm302_vm0, %v3107_v10 }
  0x28   : > { %2805 = vmatmul.msk.f32.gmra.mxu3 %vm302_vm0, %v3107_v10 }
  0x90   : > { %v329_v13 = vpop.f32.mrf.mxu0 }
  0x91   : > { %v330_v14 = vadd.f32 %v329_v13, %v296_v12  ;;  %v3124_v19 = vpop.f32.mrf.mxu1 }
  0x92   : > { %v3220_v3 = vadd.f32 %v3124_v19, %v297_v40  ;;  %v588_v19 = vld [vmem:[%s4285_s5 + $0x10] sm:$0xff] }
  0x93   : > { %v3119_v15 = vmul.f32 0.125, %v330_v14  ;;  %2806 = vmatpush.xpose.msk.msrb.mxu3 %vm730_vm1, %v588_v19 }
  0x95   : > { %v444_v16 = vperm.slane %v3119_v15, 0  ;;  %v406_v17 = vrot.slane %v3119_v15, 5  ;;  %v403_v18 = vrot.slane %v3119_v15, 2  ;;  %v402_v23 = vrot.slane %v3119_v15, 1 }
  0x96   : > { %v404_v25 = vrot.slane %v3119_v15, 3  ;;  %v405_v26 = vrot.slane %v3119_v15, 4  ;;  %v407_v32 = vrot.slane %v3119_v15, 6  ;;  %v408_v34 = vrot.slane %v3119_v15, 7 }
  0x97   : > { %468 = vrot.lane.b32.xlu0 %v444_v16, %s3013_s27  ;;  %v449_v20 = vperm.slane %v406_v17, 0  ;;  %v446_v21 = vperm.slane %v403_v18, 0  ;;  %v445_v27 = vperm.slane %v402_v23, 0  ;;  %v599_v16 = vld [vmem:[%s4285_s5 + $0x68] sm:$0xff] }
  0x98   : > { %v332_v22 = vpop.f32.mrf.mxu0  ;;  %v447_v29 = vperm.slane %v404_v25, 0  ;;  %v448_v30 = vperm.slane %v405_v26, 0  ;;  %v450_v35 = vperm.slane %v407_v32, 0  ;;  %v451_v38 = vperm.slane %v408_v34, 0  ;;  %2823 = vmatpush.xpose.msk.msra.mxu0 %vm730_vm1, %v599_v16 }
  0x99   : > { %478 = vrot.lane.b32.xlu1 %v449_v20, %s3013_s27  ;;  %472 = vrot.lane.b32.xlu2 %v446_v21, %s3013_s27  ;;  %v333_v24 = vadd.f32 %v332_v22, %v296_v12  ;;  %v358_v31 = vpop.f32.mrf.mxu1  ;;  %v598_v21 = vld [vmem:[%s4285_s5 + $0x60] sm:$0xff] }
  0x9a   : > { %v3211_v0 = vadd.f32 %v358_v31, %v297_v40  ;;  %v586_v31 = vld [vmem:[%s4285_s5] sm:$0xff] }
  0x9b   : > { %v3138_v28 = vmul.f32 0.125, %v333_v24 }
  0x9c   : > { %2824 = vmatpush.xpose.msk.msra.mxu0 %vm730_vm1, %v598_v21  ;;  %v602_v21 = vld [vmem:[%s4285_s5 + $0x80] sm:$0xff] }
  0x9d   : > { %v409_v33 = vrot.slane %v3138_v28, 1  ;;  %v413_v39 = vrot.slane %v3138_v28, 5  ;;  %v452_v46 = vperm.slane %v3138_v28, 0  ;;  %v412_v47 = vrot.slane %v3138_v28, 4 }
  0x9e   : > { %v411_v54 = vrot.slane %v3138_v28, 3  ;;  %v410_v55 = vrot.slane %v3138_v28, 2  ;;  %v415_v6 = vrot.slane %v3138_v28, 7  ;;  %v414_v7 = vrot.slane %v3138_v28, 6 }
  0x9f   : > { %470 = vrot.lane.b32.xlu0 %v445_v27, %s3013_s27  ;;  %v453_v36 = vperm.slane %v409_v33, 0  ;;  %v457_v43 = vperm.slane %v413_v39, 0  ;;  %v456_v49 = vperm.slane %v412_v47, 0  ;;  %v587_v27 = vld [vmem:[%s4285_s5 + $0x8] sm:$0xff] }
  0xa0   : > { %v335_v37 = vpop.f32.mrf.mxu0  ;;  %v455_v56 = vperm.slane %v411_v54, 0  ;;  %v454_v57 = vperm.slane %v410_v55, 0  ;;  %v458_v13 = vperm.slane %v414_v7, 0  ;;  %2807 = vmatpush.xpose.msk.msrb.mxu3 %vm730_vm1, %v587_v27  ;;  %v635_v27 = vld [vmem:[%s4285_s5 + $0x188] sm:$0xff] }
  0xa1   : > { %474 = vrot.lane.b32.xlu1 %v447_v29, %s3013_s27  ;;  %476 = vrot.lane.b32.xlu2 %v448_v30, %s3013_s27  ;;  %v336_v41 = vadd.f32 %v335_v37, %v296_v12  ;;  %v361_v42 = vpop.f32.mrf.mxu1  ;;  %v459_v12 = vperm.slane %v415_v6, 0  ;;  %v612_v29 = vld [vmem:[%s4285_s5 + $0xd0] sm:$0xff]  ;;  %v611_v37 = vld [vmem:[%s4285_s5 + $0xc8] sm:$0xff] }
  0xa2   : > { %v3163_v44 = vadd.f32 %v361_v42, %v297_v40  ;;  %2838 = vmatpush.xpose.msk.msra.mxu2 %vm730_vm1, %v612_v29  ;;  %v589_v40 = vld [vmem:[%s4285_s5 + $0x18] sm:$0xff]  ;;  %v596_v42 = vld [vmem:[%s4285_s5 + $0x50] sm:$0xff] }
  0xa3   : > { %v3165_v45 = vmul.f32 0.125, %v336_v41  ;;  %v610_v41 = vld [vmem:[%s4285_s5 + $0xc0] sm:$0xff] }
  0xa4   : > { %2808 = vmatpush.xpose.msk.msrb.mxu3 %vm730_vm1, %v586_v31  ;;  %v615_v31 = vld [vmem:[%s4285_s5 + $0xe8] sm:$0xff] }
  0xa5   : > { %v416_v48 = vrot.slane %v3165_v45, 1  ;;  %v460_v51 = vperm.slane %v3165_v45, 0  ;;  %v420_v52 = vrot.slane %v3165_v45, 5  ;;  %v419_v58 = vrot.slane %v3165_v45, 4 }
  0xa6   : > { %v418_v8 = vrot.slane %v3165_v45, 3  ;;  %v417_v14 = vrot.slane %v3165_v45, 2  ;;  %v422_v22 = vrot.slane %v3165_v45, 7  ;;  %v421_v24 = vrot.slane %v3165_v45, 6  ;;  %2839 = vmatpush.xpose.msk.msra.mxu2 %vm730_vm1, %v611_v37  ;;  %v621_v37 = vld [vmem:[%s4285_s5 + $0x118] sm:$0xff] }
  0xa7   : > { %480 = vrot.lane.b32.xlu0 %v450_v35, %s3013_s27  ;;  %v461_v50 = vperm.slane %v416_v48, 0  ;;  %v465_v53 = vperm.slane %v420_v52, 0  ;;  %v464_v1 = vperm.slane %v419_v58, 0  ;;  %v591_v35 = vld [vmem:[%s4285_s5 + $0x28] sm:$0xff] }
  0xa8   : > { %v463_v9 = vperm.slane %v418_v8, 0  ;;  %v462_v20 = vperm.slane %v417_v14, 0  ;;  %v467_v10 = vperm.slane %v422_v22, 0  ;;  %v466_v30 = vperm.slane %v421_v24, 0  ;;  %2810 = vmatpush.xpose.msk.msra.mxu3 %vm730_vm1, %v591_v35 }
  0xa9   : > { %486 = vrot.lane.b32.xlu1 %v453_v36, %s3013_s27  ;;  %482 = vrot.lane.b32.xlu2 %v451_v38, %s3013_s27  ;;  %v590_v36 = vld [vmem:[%s4285_s5 + $0x20] sm:$0xff]  ;;  %v597_v38 = vld [vmem:[%s4285_s5 + $0x58] sm:$0xff] }
  0xaa   : > { %2818 = vmatpush.xpose.msk.msrb.mxu1 %vm730_vm1, %v597_v38  ;;  %2840 = vmatpush.xpose.msk.msra.mxu2 %vm730_vm1, %v610_v41  ;;  %v634_v38 = vld [vmem:[%s4285_s5 + $0x180] sm:$0xff]  ;;  %v620_v41 = vld [vmem:[%s4285_s5 + $0x110] sm:$0xff] }
  0xac   : > { %2811 = vmatpush.xpose.msk.msra.mxu3 %vm730_vm1, %v590_v36 }
  0xae   : > { %2819 = vmatpush.xpose.msk.msrb.mxu1 %vm730_vm1, %v596_v42 }
  0xaf   : > { %494 = vrot.lane.b32.xlu0 %v457_v43, %s3013_s27  ;;  %v595_v43 = vld [vmem:[%s4285_s5 + $0x48] sm:$0xff] }
  0xb0   : > { %2812 = vmatpush.xpose.msk.msra.mxu3 %vm730_vm1, %v589_v40  ;;  %v614_v40 = vld [vmem:[%s4285_s5 + $0xe0] sm:$0xff] }
  0xb1   : > { %572 = vrot.lane.b32.xlu1 %v3163_v44, %s3013_s27  ;;  %484 = vrot.lane.b32.xlu2 %v452_v46, %s3013_s27  ;;  %v609_v46 = vld [vmem:[%s4285_s5 + $0xb8] sm:$0xff] }
  0xb2   : > { %2820 = vmatpush.xpose.msk.msrb.mxu1 %vm730_vm1, %v595_v43 }
  0xb6   : > { %2834 = vmatpush.xpose.msk.msra.mxu1 %vm730_vm1, %v609_v46 }
  0xb7   : > { %492 = vrot.lane.b32.xlu0 %v456_v49, %s3013_s27 }
  0xb9   : > { %502 = vrot.lane.b32.xlu1 %v461_v50, %s3013_s27  ;;  %500 = vrot.lane.b32.xlu2 %v460_v51, %s3013_s27  ;;  %v606_v50 = vld [vmem:[%s4285_s5 + $0xa0] sm:$0xff] }
  0xbf   : > { %510 = vrot.lane.b32.xlu0 %v465_v53, %s3013_s27  ;;  %v608_v53 = vld [vmem:[%s4285_s5 + $0xb0] sm:$0xff] }
  0xc0   : > { %2835 = vmatpush.xpose.msk.msra.mxu1 %vm730_vm1, %v608_v53 }
  0xc1   : > { %490 = vrot.lane.b32.xlu1 %v455_v56, %s3013_s27  ;;  %488 = vrot.lane.b32.xlu2 %v454_v57, %s3013_s27  ;;  %v605_v56 = vld [vmem:[%s4285_s5 + $0x98] sm:$0xff]  ;;  %v624_v57 = vld [vmem:[%s4285_s5 + $0x130] sm:$0xff] }
  0xc2   : > { %2854 = vmatpush.xpose.msk.msrb.mxu2 %vm730_vm1, %v624_v57  ;;  %v629_v57 = vld [vmem:[%s4285_s5 + $0x158] sm:$0xff] }
  0xc6   : > { %2855 = vmatpush.xpose.msk.msrb.mxu2 %vm730_vm1, %v623_v63  ;;  %v642_v63 = vld [vmem:[%s4285_s5 + $0x1c0] sm:$0xff] }
  0xc7   : > { %570 = vrot.lane.b32.xlu0 %v3211_v0, %s3013_s27 }
  0xc9   : > { %568 = vrot.lane.b32.xlu1 %v3220_v3, %s3013_s27  ;;  %508 = vrot.lane.b32.xlu2 %v464_v1, %s3013_s27  ;;  %v617_v1 = vld [vmem:[%s4285_s5 + $0xf8] sm:$0xff] }
  0xcf   : > { %396 = vrot.lane.b32.xlu0 %v3119_v15, %s3013_s27 }
  0xd1   : > { %498 = vrot.lane.b32.xlu1 %v459_v12, %s3013_s27  ;;  %496 = vrot.lane.b32.xlu2 %v458_v13, %s3013_s27  ;;  %v603_v12 = vld [vmem:[%s4285_s5 + $0x88] sm:$0xff] }
  0xd7   : > { %398 = vrot.lane.b32.xlu0 %v3138_v28, %s3013_s27 }
  0xd9   : > { %506 = vrot.lane.b32.xlu1 %v463_v9, %s3013_s27  ;;  %504 = vrot.lane.b32.xlu2 %v462_v20, %s3013_s27  ;;  %v636_v9 = vld [vmem:[%s4285_s5 + $0x190] sm:$0xff] }
  0xdf   : > { %400 = vrot.lane.b32.xlu0 %v3165_v45, %s3013_s27 }
  0xe1   : > { %514 = vrot.lane.b32.xlu1 %v467_v10, %s3013_s27  ;;  %512 = vrot.lane.b32.xlu2 %v466_v30, %s3013_s27  ;;  %v601_v10 = vld [vmem:[%s4285_s5 + $0x78] sm:$0xff] }
  0xf3   : > { %v473_v49 = vpop.permute.xlu2 %472 }
  0xf4   : > { %v543_v51 = vsel %vm540_vm2, %v403_v18, %v473_v49  ;;  %v607_v18 = vld [vmem:[%s4285_s5 + $0xa8] sm:$0xff]  ;;  %v613_v49 = vld [vmem:[%s4285_s5 + $0xd8] sm:$0xff] }
  0xf5   : > { %2817 = vmatmul.msk.f32.vlgmr.msrb.gmra.mxu0 %vm730_vm1, %v543_v51  ;;  %2836 = vmatpush.xpose.msk.msra.mxu1 %vm730_vm1, %v607_v18 }
  0xf6   : > { %2830 = vmatpush.xpose.msk.msrb.mxu0 %vm730_vm1, %v606_v50 }
  0xfa   : > { %2831 = vmatpush.xpose.msk.msrb.mxu0 %vm730_vm1, %v605_v56  ;;  %v633_v56 = vld [vmem:[%s4285_s5 + $0x178] sm:$0xff] }
  0xfb   : > { %v477_v59 = vpop.permute.xlu2 %476 }
  0xfc   : > { %v545_v61 = vsel %vm540_vm2, %v405_v26, %v477_v59  ;;  %v622_v26 = vld [vmem:[%s4285_s5 + $0x120] sm:$0xff]  ;;  %v628_v59 = vld [vmem:[%s4285_s5 + $0x150] sm:$0xff] }
  0xfd   : > { %2825 = vmatmul.msk.f32.vlgmr.msra.gmra.mxu0 %vm730_vm1, %v545_v61  ;;  %2856 = vmatpush.xpose.msk.msrb.mxu2 %vm730_vm1, %v622_v26 }
  0xfe   : > { %2832 = vmatpush.xpose.msk.msrb.mxu0 %vm730_vm1, %v604_v60  ;;  %v632_v60 = vld [vmem:[%s4285_s5 + $0x170] sm:$0xff] }
 0x102   : > { %2846 = vmatpush.xpose.msk.msra.mxu0 %vm730_vm1, %v618_v62 }
 0x103   : > { %v483_v2 = vpop.permute.xlu2 %482 }
 0x104   : > { %v548_v53 = vsel %vm540_vm2, %v408_v34, %v483_v2  ;;  %v626_v34 = vld [vmem:[%s4285_s5 + $0x140] sm:$0xff]  ;;  %v631_v2 = vld [vmem:[%s4285_s5 + $0x168] sm:$0xff] }
 0x106   : > { %2847 = vmatpush.xpose.msk.msra.mxu0 %vm730_vm1, %v617_v1 }
 0x109   : > { %v469_v5 = vpop.permute.xlu0 %468 }
 0x10a   : > { %2848 = vmatpush.xpose.msk.msra.mxu0 %vm730_vm1, %v616_v4  ;;  %v541_v13 = vsel %vm540_vm2, %v3119_v15, %v469_v5  ;;  %v641_v4 = vld [vmem:[%s4285_s5 + $0x1b8] sm:$0xff]  ;;  %v638_v5 = vld [vmem:[%s4285_s5 + $0x1a0] sm:$0xff] }
 0x10b   : > { %2809 = vmatmul.msk.f32.vlgmr.msrb.gmra.mxu3 %vm730_vm1, %v541_v13  ;;  %v479_v16 = vpop.permute.xlu1 %478  ;;  %v485_v19 = vpop.permute.xlu2 %484  ;;  %v648_v13 = vld [vmem:[%s4285_s5 + $0x1f0] sm:$0xff] }
 0x10c   : > { %2826 = vmatpush.xpose.msk.msrb.mxu3 %vm730_vm1, %v603_v12  ;;  %v549_v20 = vsel %vm540_vm2, %v3138_v28, %v485_v19  ;;  %v546_v43 = vsel %vm540_vm2, %v406_v17, %v479_v16  ;;  %v627_v17 = vld [vmem:[%s4285_s5 + $0x148] sm:$0xff] }
 0x10d   : > { %2841 = vmatmul.msk.f32.vlgmr.msra.gmra.mxu2 %vm730_vm1, %v549_v20 }
 0x10e   : > { %2870 = vmatpush.xpose.msk.msra.mxu2 %vm730_vm1, %v636_v9 }
 0x110   : > { %2827 = vmatpush.xpose.msk.msrb.mxu3 %vm730_vm1, %v602_v21  ;;  %v640_v21 = vld [vmem:[%s4285_s5 + $0x1b0] sm:$0xff] }
 0x111   : > { %v471_v29 = vpop.permute.xlu0 %470 }
 0x112   : > { %v542_v30 = vsel %vm540_vm2, %v402_v23, %v471_v29  ;;  %2871 = vmatpush.xpose.msk.msra.mxu2 %vm730_vm1, %v635_v27  ;;  %v647_v29 = vld [vmem:[%s4285_s5 + $0x1e8] sm:$0xff] }
 0x113   : > { %v475_v35 = vpop.permute.xlu1 %474  ;;  %v3414_v36 = vpop.permute.xlu2 %500  ;;  %2813 = vmatmul.msk.f32.vlgmr.msra.gmra.mxu3 %vm730_vm1, %v542_v30 }
 0x114   : > { %2828 = vmatpush.xpose.msk.msrb.mxu3 %vm730_vm1, %v601_v10  ;;  %v544_v23 = vsel %vm540_vm2, %v404_v25, %v475_v35  ;;  %v630_v25 = vld [vmem:[%s4285_s5 + $0x160] sm:$0xff]  ;;  %v653_v10 = vld [vmem:[%s4285_s5 + $0x218] sm:$0xff]  ;;  %v557_v35 = vsel %vm540_vm2, %v3165_v45, %v3414_v36 }
 0x115   : > { %2821 = vmatmul.msk.f32.vlgmr.msrb.gmra.mxu1 %vm730_vm1, %v544_v23 }
 0x116   : > { %2850 = vmatpush.xpose.msk.msrb.mxu1 %vm730_vm1, %v621_v37  ;;  %2872 = vmatpush.xpose.msk.msra.mxu2 %vm730_vm1, %v634_v38  ;;  %v650_v37 = vld [vmem:[%s4285_s5 + $0x200] sm:$0xff] }
 0x118   : > { %2842 = vmatpush.xpose.msk.msra.mxu3 %vm730_vm1, %v615_v31  ;;  %v646_v31 = vld [vmem:[%s4285_s5 + $0x1e0] sm:$0xff] }
 0x119   : > { %v481_v42 = vpop.permute.xlu0 %480 }
 0x11a   : > { %v547_v46 = vsel %vm540_vm2, %v407_v32, %v481_v42  ;;  %2851 = vmatpush.xpose.msk.msrb.mxu1 %vm730_vm1, %v620_v41  ;;  %v619_v32 = vld [vmem:[%s4285_s5 + $0x108] sm:$0xff]  ;;  %v645_v42 = vld [vmem:[%s4285_s5 + $0x1d8] sm:$0xff] }
 0x11b   : > { %v487_v50 = vpop.permute.xlu1 %486  ;;  %v489_v51 = vpop.permute.xlu2 %488  ;;  %2829 = vmatmul.msk.f32.vlgmr.msrb.gmra.mxu3 %vm730_vm1, %v546_v43  ;;  %2833 = vmatmul.msk.f32.vlgmr.msrb.gmra.mxu0 %vm730_vm1, %v547_v46 }
 0x11c   : > { %2843 = vmatpush.xpose.msk.msra.mxu3 %vm730_vm1, %v614_v40  ;;  %2862 = vmatpush.xpose.msk.msrb.mxu0 %vm730_vm1, %v630_v25  ;;  %v550_v61 = vsel %vm540_vm2, %v409_v33, %v487_v50  ;;  %v551_v62 = vsel %vm540_vm2, %v410_v55, %v489_v51  ;;  %v625_v33 = vld [vmem:[%s4285_s5 + $0x138] sm:$0xff]  ;;  %v639_v55 = vld [vmem:[%s4285_s5 + $0x1a8] sm:$0xff]  ;;  %v656_v51 = vld [vmem:[%s4285_s5 + $0x230] sm:$0xff] }
 0x11d   : > { %2837 = vmatmul.msk.f32.vlgmr.msra.gmra.mxu1 %vm730_vm1, %v548_v53  ;;  %v381_v53 = vpop.f32.mrf.mxu3 }
 0x11e   : > { %2852 = vmatpush.xpose.msk.msrb.mxu1 %vm730_vm1, %v619_v32 }
 0x120   : > { %2844 = vmatpush.xpose.msk.msra.mxu3 %vm730_vm1, %v613_v49  ;;  %2863 = vmatpush.xpose.msk.msrb.mxu0 %vm730_vm1, %v629_v57 }
 0x121   : > { %v495_v18 = vpop.permute.xlu0 %494 }
 0x122   : > { %2866 = vmatpush.xpose.msk.msra.mxu1 %vm730_vm1, %v633_v56  ;;  %v554_v19 = vsel %vm540_vm2, %v413_v39, %v495_v18  ;;  %v637_v39 = vld [vmem:[%s4285_s5 + $0x198] sm:$0xff] }
 0x123   : > { %v3494_v26 = vpop.permute.xlu1 %572  ;;  %v3496_v1 = vpop.permute.xlu2 %508  ;;  %2845 = vmatmul.msk.f32.vlgmr.msra.gmra.mxu3 %vm730_vm1, %v550_v61  ;;  %2849 = vmatmul.msk.f32.vlgmr.msra.gmra.mxu0 %vm730_vm1, %v551_v62 }
 0x124   : > { %2858 = vmatpush.xpose.msk.msrb.mxu3 %vm730_vm1, %v627_v17  ;;  %2864 = vmatpush.xpose.msk.msrb.mxu0 %vm730_vm1, %v628_v59  ;;  %v561_v25 = vsel %vm540_vm2, %v419_v58, %v3496_v1  ;;  %v643_v58 = vld [vmem:[%s4285_s5 + $0x1c8] sm:$0xff] }
 0x126   : > { %2867 = vmatpush.xpose.msk.msra.mxu1 %vm730_vm1, %v632_v60 }
 0x128   : > { %2859 = vmatpush.xpose.msk.msrb.mxu3 %vm730_vm1, %v626_v34  ;;  %2878 = vmatpush.xpose.msk.msra.mxu0 %vm730_vm1, %v642_v63  ;;  %v298_v34 = vperm.slane %v3116_v11, 2 }
 0x129   : > { %v493_v12 = vpop.permute.xlu0 %492 }
 0x12a   : > { %2868 = vmatpush.xpose.msk.msra.mxu1 %vm730_vm1, %v631_v2  ;;  %v553_v16 = vsel %vm540_vm2, %v412_v47, %v493_v12  ;;  %v654_v47 = vld [vmem:[%s4285_s5 + $0x220] sm:$0xff]  ;;  %v3668_v61 = vadd.f32 %v381_v53, %v298_v34 }
 0x12b   : > { %v503_v9 = vpop.permute.xlu1 %502  ;;  %v497_v20 = vpop.permute.xlu2 %496  ;;  %2857 = vmatmul.msk.f32.vlgmr.msrb.gmra.mxu2 %vm730_vm1, %v553_v16 }
 0x12c   : > { %2860 = vmatpush.xpose.msk.msrb.mxu3 %vm730_vm1, %v625_v33  ;;  %2879 = vmatpush.xpose.msk.msra.mxu0 %vm730_vm1, %v641_v4  ;;  %v555_v27 = vsel %vm540_vm2, %v414_v7, %v497_v20  ;;  %v651_v7 = vld [vmem:[%s4285_s5 + $0x208] sm:$0xff]  ;;  %v558_v38 = vsel %vm540_vm2, %v416_v48, %v503_v9  ;;  %v652_v48 = vld [vmem:[%s4285_s5 + $0x210] sm:$0xff] }
 0x12d   : > { %2886 = vmatpush.xpose.msk.msrb.mxu2 %vm730_vm1, %v648_v13  ;;  %2865 = vmatmul.msk.f32.vlgmr.msrb.gmra.mxu0 %vm730_vm1, %v555_v27 }
 0x12f   : > { %2861 = vmatmul.msk.f32.vlgmr.msrb.gmra.mxu3 %vm730_vm1, %v554_v19 }
 0x130   : > { %2874 = vmatpush.xpose.msk.msra.mxu3 %vm730_vm1, %v639_v55  ;;  %2880 = vmatpush.xpose.msk.msra.mxu0 %vm730_vm1, %v640_v21 }
 0x131   : > { %2887 = vmatpush.xpose.msk.msrb.mxu2 %vm730_vm1, %v647_v29  ;;  %v511_v30 = vpop.permute.xlu0 %510 }
 0x132   : > { %v562_v43 = vsel %vm540_vm2, %v420_v52, %v511_v30 }
 0x133   : > { %v491_v23 = vpop.permute.xlu1 %490  ;;  %v505_v40 = vpop.permute.xlu2 %504  ;;  %2873 = vmatmul.msk.f32.vlgmr.msra.gmra.mxu2 %vm730_vm1, %v557_v35 }
 0x134   : > { %2875 = vmatpush.xpose.msk.msra.mxu3 %vm730_vm1, %v638_v5  ;;  %2894 = vmatpush.xpose.msk.msrb.mxu0 %vm730_vm1, %v654_v47  ;;  %v552_v41 = vsel %vm540_vm2, %v411_v54, %v491_v23  ;;  %v559_v36 = vsel %vm540_vm2, %v417_v14, %v505_v40  ;;  %v649_v54 = vld [vmem:[%s4285_s5 + $0x1f8] sm:$0xff]  ;;  %v644_v14 = vld [vmem:[%s4285_s5 + $0x1d0] sm:$0xff]  ;;  %v1717_v40 = vlaneseq }
 0x135   : > { %2888 = vmatpush.xpose.msk.msrb.mxu2 %vm730_vm1, %v646_v31  ;;  %2853 = vmatmul.msk.f32.vlgmr.msrb.gmra.mxu1 %vm730_vm1, %v552_v41 }
 0x136   : > { %2881 = vmatmul.msk.f32.vlgmr.msra.gmra.mxu0 %vm730_vm1, %v559_v36  ;;  %2882 = vmatpush.xpose.msk.msrb.mxu1 %vm730_vm1, %v645_v42 }
 0x138   : > { %2876 = vmatpush.xpose.msk.msra.mxu3 %vm730_vm1, %v637_v39  ;;  %2895 = vmatpush.xpose.msk.msrb.mxu0 %vm730_vm1, %v653_v10 }
 0x139   : > { %2902 = vmatpush.xpose.msk.msra.mxu2 %vm730_vm1, %v3163_v44  ;;  %v571_v44 = vpop.permute.xlu0 %570 }
 0x13a   : > { %2883 = vmatpush.xpose.msk.msrb.mxu1 %vm730_vm1, %v644_v14 }
 0x13b   : > { %2877 = vmatmul.msk.f32.vlgmr.msra.gmra.mxu3 %vm730_vm1, %v558_v38  ;;  %v569_v46 = vpop.permute.xlu1 %568  ;;  %v513_v49 = vpop.permute.xlu2 %512  ;;  %2889 = vmatmul.msk.f32.vlgmr.msrb.gmra.mxu2 %vm730_vm1, %v561_v25 }
 0x13c   : > { %2890 = vmatpush.xpose.msk.msrb.mxu3 %vm730_vm1, %v651_v7  ;;  %2896 = vmatpush.xpose.msk.msrb.mxu0 %vm730_vm1, %v652_v48 }
 0x13d   : > { %2903 = vmatpush.xpose.msk.msra.mxu2 %vm730_vm1, %v3211_v0  ;;  %v563_v0 = vsel %vm540_vm2, %v421_v24, %v513_v49  ;;  %v657_v24 = vld [vmem:[%s4285_s5 + $0x238] sm:$0xff] }
 0x13e   : > { %2884 = vmatpush.xpose.msk.msrb.mxu1 %vm730_vm1, %v643_v58 }
 0x13f   : > { %2897 = vmatmul.msk.f32.vlgmr.msrb.gmra.mxu0 %vm730_vm1, %v563_v0  ;;  %v1718_v0 = vand.u32 127, %v1717_v40 }
 0x140   : > { %2891 = vmatpush.xpose.msk.msrb.mxu3 %vm730_vm1, %v650_v37 }
 0x141   : > { %2904 = vmatpush.xpose.msk.msra.mxu2 %vm730_vm1, %v3220_v3  ;;  %v397_v52 = vpop.permute.xlu0 %396  ;;  %vm1719_vm10 = vcmp.lt.s32.totalorder %v1718_v0, 17 }
 0x143   : > { %v499_v50 = vpop.permute.xlu1 %498 }
 0x144   : > { %2892 = vmatpush.xpose.msk.msrb.mxu3 %vm730_vm1, %v649_v54  ;;  %2905 = vmatmul.msk.f32.vlgmr.msra.gmra.mxu2 %vm730_vm1, %v3119_v15  ;;  %v556_v3 = vsel %vm540_vm2, %v415_v6, %v499_v50  ;;  %v655_v6 = vld [vmem:[%s4285_s5 + $0x228] sm:$0xff] }
 0x145   : > { %2869 = vmatmul.msk.f32.vlgmr.msra.gmra.mxu1 %vm730_vm1, %v556_v3 }
 0x146   : > { %2898 = vmatpush.xpose.msk.msra.mxu1 %vm730_vm1, %v657_v24 }
 0x147   : > { %2893 = vmatmul.msk.f32.vlgmr.msrb.gmra.mxu3 %vm730_vm1, %v562_v43 }
 0x148   : > { %2926 = vmatpush.xpose.msk.msra.mxu3 %vm730_vm1, %v3494_v26 }
 0x149   : > { %v399_v17 = vpop.permute.xlu0 %398 }
 0x14a   : > { %2899 = vmatpush.xpose.msk.msra.mxu1 %vm730_vm1, %v656_v51 }
 0x14b   : > { %v507_v15 = vpop.permute.xlu1 %506 }
 0x14c   : > { %2927 = vmatpush.xpose.msk.msra.mxu3 %vm730_vm1, %v571_v44  ;;  %2906 = vmatmul.msk.f32.gmra.mxu2 %vm730_vm1, %v3138_v28  ;;  %v560_v32 = vsel %vm540_vm2, %v418_v8, %v507_v15  ;;  %v384_v8 = vpop.f32.mrf.mxu3 }
 0x14d   : > { %2885 = vmatmul.msk.f32.vlgmr.msrb.gmra.mxu1 %vm730_vm1, %v560_v32  ;;  %v3664_v59 = vadd.f32 %v384_v8, %v298_v34 }
 0x14e   : > { %2900 = vmatpush.xpose.msk.msra.mxu1 %vm730_vm1, %v655_v6 }
 0x150   : > { %2928 = vmatpush.xpose.msk.msra.mxu3 %vm730_vm1, %v569_v46 }
 0x151   : > { %v401_v56 = vpop.permute.xlu0 %400 }
 0x153   : > { %2929 = vmatmul.msk.f32.vlgmr.msra.gmra.mxu3 %vm730_vm1, %v397_v52  ;;  %v515_v57 = vpop.permute.xlu1 %514 }
 0x154   : > { %2907 = vmatmul.msk.f32.gmra.mxu2 %vm730_vm1, %v3165_v45  ;;  %v564_v28 = vsel %vm540_vm2, %v422_v22, %v515_v57  ;;  %v387_v18 = vpop.f32.mrf.mxu3 }
 0x155   : > { %2901 = vmatmul.msk.f32.vlgmr.msra.gmra.mxu1 %vm730_vm1, %v564_v28  ;;  %v3666_v60 = vadd.f32 %v387_v18, %v298_v34 }
 0x157   : > { %v2975_v62 = vpack.i.bf16 %v3664_v59, %v3666_v60  ;;  %1816 = vmatpush.msra.mxu0 %v3666_v60 }
 0x159   : > { %1817 = vmatpush.msra.mxu0 %v3664_v59 }
 0x15b   : > { %2930 = vmatmul.msk.f32.gmra.mxu3 %vm730_vm1, %v399_v17  ;;  %1818 = vmatpush.msra.mxu0 %v3668_v61 }
 0x163   : > { %2931 = vmatmul.msk.f32.gmra.mxu3 %vm730_vm1, %v401_v56 }
 0x172   : > { %v824_v63 = vpop.f32.mrf.mxu0 }
 0x173   : > { %v1550_v20 = vrot.slane %v824_v63, 6  ;;  %v2909_v39 = vrot.slane %v824_v63, 7 }
 0x17a   : > { %v888_v26 = vpop.f32.mrf.mxu0 }
 0x17b   : > { %v1556_v35 = vrot.slane %v888_v26, 4  ;;  %v2911_v48 = vrot.slane %v888_v26, 5 }
 0x18e   : > { %v760_v45 = vpop.f32.mrf.mxu3 }
 0x18f   : > { %v1523_v19 = vrot.slane %v760_v45, 1 }
 0x190   : > { %v1016_v1 = vpop.f32.mrf.mxu2 }
 0x191   : > { %v1531_v42 = vrot.slane %v1016_v1, 1 }
 0x192   : > { %v856_v55 = vpop.f32.mrf.mxu1 }
 0x193   : > { %v1553_v7 = vrot.slane %v856_v55, 5  ;;  %v2910_v30 = vrot.slane %v856_v55, 6 }
 0x196   : > { %v792_v22 = vpop.f32.mrf.mxu3 }
 0x197   : > { %v1547_v12 = vrot.slane %v792_v22, 7  ;;  %v1635_v21 = vsel %vm1548_vm3, %v792_v22, %v1523_v19 }
 0x198   : > { %v952_v2 = vpop.f32.mrf.mxu0  ;;  %v1637_v10 = vsel %vm1551_vm4, %v2909_v39, %v1635_v21 }
 0x199   : > { %v1549_v9 = vsel %vm1548_vm3, %v1547_v12, %v760_v45  ;;  %v1639_v41 = vsel %vm1554_vm5, %v2910_v30, %v1637_v10  ;;  %v1562_v54 = vrot.slane %v952_v2, 2  ;;  %v2913_v3 = vrot.slane %v952_v2, 3 }
 0x19a   : > { %v984_v13 = vpop.f32.mrf.mxu1  ;;  %v1552_v29 = vsel %vm1551_vm4, %v1550_v20, %v1549_v9  ;;  %v1641_v49 = vsel %vm1557_vm6, %v2911_v48, %v1639_v41 }
 0x19b   : > { %v1555_v23 = vsel %vm1554_vm5, %v1553_v7, %v1552_v29  ;;  %v1530_v25 = vrot.slane %v984_v13, 1 }
 0x19c   : > { %v1558_v44 = vsel %vm1557_vm6, %v1556_v35, %v1555_v23 }
 0x19d   : > { %v1646_v53 = vrot.slane %v1530_v25, 1 }
 0x19e   : > { %v920_v11 = vpop.f32.mrf.mxu3 }
 0x19f   : > { %v1559_v37 = vrot.slane %v920_v11, 3  ;;  %v2912_v36 = vrot.slane %v920_v11, 4 }
 0x1a0   : > { %v3679_v16 = vpop.f32.mrf.mxu0 }
 0x1a1   : > { %v1561_v46 = vsel %vm1560_vm7, %v1559_v37, %v1558_v44  ;;  %v1643_v24 = vsel %vm1560_vm7, %v2912_v36, %v1641_v49  ;;  %v2915_v51 = vrot.slane %v3679_v16, 7  ;;  %v1569_v28 = vrot.slane %v3679_v16, 6 }
 0x1a2   : > { %v1564_v15 = vsel %vm1563_vm8, %v1562_v54, %v1561_v46  ;;  %v1645_v32 = vsel %vm1563_vm8, %v2913_v3, %v1643_v24 }
 0x1a3   : > { %v1566_v63 = vsel %vm1565_vm9, %v1530_v25, %v1564_v15  ;;  %v1647_v26 = vsel %vm1565_vm9, %v1646_v53, %v1645_v32 }
 0x1a6   : > { %v1048_v33 = vpop.f32.mrf.mxu3 }
 0x1a7   : > { %v1567_v58 = vrot.slane %v1048_v33, 7  ;;  %v1649_v52 = vsel %vm1548_vm3, %v1048_v33, %v1531_v42  ;;  %v3014_v33 = vmov -1e+30  }
 0x1a8   : > { %v1651_v6 = vsel %vm1551_vm4, %v2915_v51, %v1649_v52  ;;  %v3716_v55 = vsel %vm1719_vm10, 0.0, %v3014_v33 }
 0x1a9   : > { %v1568_v56 = vsel %vm1548_vm3, %v1567_v58, %v1016_v1 }
 0x1aa   : > { %v3689_v38 = vpop.f32.mrf.mxu0  ;;  %v1570_v2 = vsel %vm1551_vm4, %v1569_v28, %v1568_v56 }
 0x1ab   : > { %v2919_v1 = vrot.slane %v3689_v38, 3 }
 0x1ae   : > { %v3675_v4 = vpop.f32.mrf.mxu2 }
 0x1af   : > { %v2917_v8 = vrot.slane %v3675_v4, 5  ;;  %v1573_v16 = vrot.slane %v3675_v4, 4 }
 0x1b2   : > { %v3677_v5 = vpop.f32.mrf.mxu3  ;;  %v1112_v31 = vpop.f32.mrf.mxu1 }
 0x1b3   : > { %v2916_v50 = vrot.slane %v1112_v31, 6  ;;  %v1336_v34 = vpop.f32.mrf.mxu0  ;;  %v1571_v22 = vrot.slane %v1112_v31, 5  ;;  %v2918_v19 = vrot.slane %v3677_v5, 4  ;;  %v1575_v46 = vrot.slane %v3677_v5, 3 }
 0x1b4   : > { %v1582_v30 = vrot.slane %v1336_v34, 6  ;;  %v2921_v4 = vrot.slane %v1336_v34, 7  ;;  %v1577_v5 = vrot.slane %v3689_v38, 2 }
 0x1b5   : > { %v1653_v57 = vsel %vm1554_vm5, %v2916_v50, %v1651_v6  ;;  %v1572_v10 = vsel %vm1554_vm5, %v1571_v22, %v1570_v2 }
 0x1b6   : > { %v3683_v27 = vpop.f32.mrf.mxu2  ;;  %v1655_v13 = vsel %vm1557_vm6, %v2917_v8, %v1653_v57  ;;  %v1574_v25 = vsel %vm1557_vm6, %v1573_v16, %v1572_v10 }
 0x1b7   : > { %v1539_v18 = vrot.slane %v3683_v27, 1  ;;  %v1657_v35 = vsel %vm1560_vm7, %v2918_v19, %v1655_v13  ;;  %v1576_v3 = vsel %vm1560_vm7, %v1575_v46, %v1574_v25 }
 0x1b8   : > { %v1659_v24 = vsel %vm1563_vm8, %v2919_v1, %v1657_v35  ;;  %v1578_v57 = vsel %vm1563_vm8, %v1577_v5, %v1576_v3  ;;  %v659_v5 = vld [vmem:[%s4286_s6 + $0x8] sm:$0xff] }
 0x1bc   : > { %v1464_v52 = vpop.f32.mrf.mxu0 }
 0x1bd   : > { %v1590_v53 = vrot.slane %v1464_v52, 2 }
 0x1be   : > { %v3685_v47 = vpop.f32.mrf.mxu3  ;;  %v3693_v14 = vpop.f32.mrf.mxu2 }
 0x1bf   : > { %v1580_v45 = vrot.slane %v3685_v47, 7  ;;  %v1663_v39 = vsel %vm1548_vm3, %v3685_v47, %v1539_v18  ;;  %v1586_v41 = vrot.slane %v3693_v14, 4  ;;  %v2923_v49 = vrot.slane %v3693_v14, 5 }
 0x1c0   : > { %v1665_v47 = vsel %vm1551_vm4, %v2921_v4, %v1663_v39  ;;  %v2925_v18 = vrot.slane %v1464_v52, 3 }
 0x1c1   : > { %v1581_v21 = vsel %vm1548_vm3, %v1580_v45, %v3683_v27 }
 0x1c2   : > { %v3703_v17 = vpop.f32.mrf.mxu1  ;;  %v1583_v48 = vsel %vm1551_vm4, %v1582_v30, %v1581_v21 }
 0x1c3   : > { %v1538_v9 = vrot.slane %v3703_v17, 1 }
 0x1c5   : > { %v1660_v36 = vrot.slane %v1538_v9, 1  ;;  %v1579_v45 = vsel %vm1565_vm9, %v1538_v9, %v1578_v57  ;;  %v670_v57 = vld [vmem:[%s4286_s6 + $0x60] sm:$0xff] }
 0x1c7   : > { %v1625_v11 = vpop.f32.mrf.mxu2  ;;  %v1661_v51 = vsel %vm1565_vm9, %v1660_v36, %v1659_v24 }
 0x1c8   : > { %v1626_v12 = vadd.f32 %v1625_v11, %v1566_v63 }
 0x1ca   : > { %v3696_v43 = vpop.f32.mrf.mxu3  ;;  %v3729_v7 = vadd.f32 %v3716_v55, %v1626_v12  ;;  %v1368_v31 = vpop.f32.mrf.mxu1 }
 0x1cb   : > { %v1584_v37 = vrot.slane %v1368_v31, 5  ;;  %v2922_v23 = vrot.slane %v1368_v31, 6  ;;  %v1588_v50 = vrot.slane %v3696_v43, 3  ;;  %v2924_v14 = vrot.slane %v3696_v43, 4 }
 0x1cc   : > { %v1728_v40 = vsel %vm1727_vm11, %v3729_v7, -inf }
 0x1cd   : > { %1729 = vmax.xlane.f32.xlu1 %v1728_v40  ;;  %v1585_v42 = vsel %vm1554_vm5, %v1584_v37, %v1583_v48  ;;  %v1667_v54 = vsel %vm1554_vm5, %v2922_v23, %v1665_v47 }
 0x1ce   : > { %v1587_v58 = vsel %vm1557_vm6, %v1586_v41, %v1585_v42  ;;  %v1669_v15 = vsel %vm1557_vm6, %v2923_v49, %v1667_v54 }
 0x1cf   : > { %v1628_v0 = vpop.f32.mrf.mxu2  ;;  %v1589_v32 = vsel %vm1560_vm7, %v1588_v50, %v1587_v58  ;;  %v1671_v34 = vsel %vm1560_vm7, %v2924_v14, %v1669_v15  ;;  %v660_v15 = vld [vmem:[%s4286_s6 + $0x10] sm:$0xff]  ;;  %v675_v14 = vld [vmem:[%s4286_s6 + $0x88] sm:$0xff] }
 0x1d0   : > { %v1591_v22 = vsel %vm1563_vm8, %v1590_v53, %v1589_v32  ;;  %v1629_v38 = vadd.f32 %v1628_v0, %v1579_v45  ;;  %v1673_v33 = vsel %vm1563_vm8, %v2925_v18, %v1671_v34  ;;  %2015 = vmatpush.msrb.mxu2 %v660_v15  ;;  %2130 = vmatpush.msrb.mxu3 %v675_v14  ;;  %v673_v32 = vld [vmem:[%s4286_s6 + $0x78] sm:$0xff]  ;;  %v672_v53 = vld [vmem:[%s4286_s6 + $0x70] sm:$0xff] }
 0x1d1   : > { %v685_v34 = vld [vmem:[%s4286_s6 + $0xd8] sm:$0xff] }
 0x1d2   : > { %v1496_v56 = vpop.f32.mrf.mxu1  ;;  %v1722_v19 = vadd.f32 %v3716_v55, %v1629_v38  ;;  %2016 = vmatpush.msrb.mxu2 %v659_v5  ;;  %v661_v15 = vld [vmem:[%s4286_s6 + $0x18] sm:$0xff]  ;;  %v707_v5 = vld [vmem:[%s4286_s6 + $0x188] sm:$0xff] }
 0x1d3   : > { %v1546_v28 = vrot.slane %v1496_v56, 1  ;;  %v671_v56 = vld [vmem:[%s4286_s6 + $0x68] sm:$0xff] }
 0x1d4   : > { %v1731_v21 = vsel %vm1727_vm11, %v1722_v19, -inf }
 0x1d5   : > { %v1674_v63 = vrot.slane %v1546_v28, 1  ;;  %v1592_v11 = vsel %vm1565_vm9, %v1546_v28, %v1591_v22  ;;  %v687_v28 = vld [vmem:[%s4286_s6 + $0xe8] sm:$0xff]  ;;  %v666_v22 = vld [vmem:[%s4286_s6 + $0x40] sm:$0xff] }
 0x1d6   : > { %v1708_v20 = vpop.f32.mrf.mxu3  ;;  %2061 = vmatpush.msrb.mxu0 %v666_v22 }
 0x1d7   : > { %v1709_v29 = vadd.f32 %v1708_v20, %v1647_v26  ;;  %v1631_v26 = vpop.f32.mrf.mxu2  ;;  %v1675_v2 = vsel %vm1565_vm9, %v1674_v63, %v1673_v33  ;;  %v665_v63 = vld [vmem:[%s4286_s6 + $0x38] sm:$0xff] }
 0x1d8   : > { %v1632_v1 = vadd.f32 %v1631_v26, %v1592_v11  ;;  %2062 = vmatpush.msrb.mxu0 %v665_v63  ;;  %v664_v11 = vld [vmem:[%s4286_s6 + $0x30] sm:$0xff] }
 0x1d9   : > { %v1724_v27 = vadd.f32 %v3716_v55, %v1709_v29 }
 0x1da   : > { %v1723_v16 = vadd.f32 %v3716_v55, %v1632_v1  ;;  %2063 = vmatpush.msrb.mxu0 %v664_v11  ;;  %v720_v11 = vld [vmem:[%s4286_s6 + $0x1f0] sm:$0xff] }
 0x1db   : > { %v1737_v44 = vsel %vm1727_vm11, %v1724_v27, -inf }
 0x1dc   : > { %1738 = vmax.xlane.f32.xlu0 %v1737_v44  ;;  %v1734_v9 = vsel %vm1727_vm11, %v1723_v16, -inf }
 0x1dd   : > { %1735 = vmax.xlane.f32.xlu1 %v1734_v9 }
 0x1de   : > { %v1711_v17 = vpop.f32.mrf.mxu3 }
 0x1df   : > { %v1712_v6 = vadd.f32 %v1711_v17, %v1661_v51 }
 0x1e1   : > { %v1725_v8 = vadd.f32 %v3716_v55, %v1712_v6  ;;  %v674_v6 = vld [vmem:[%s4286_s6 + $0x80] sm:$0xff] }
 0x1e2   : > { %2131 = vmatpush.msrb.mxu3 %v674_v6 }
 0x1e3   : > { %v1740_v43 = vsel %vm1727_vm11, %v1725_v8, -inf }
 0x1e4   : > { %1741 = vmax.xlane.f32.xlu2 %v1740_v43  ;;  %2132 = vmatpush.msrb.mxu3 %v673_v32  ;;  %v710_v32 = vld [vmem:[%s4286_s6 + $0x1a0] sm:$0xff] }
 0x1e6   : > { %v1714_v12 = vpop.f32.mrf.mxu3  ;;  %2222 = vmatpush.msra.mxu3 %v687_v28 }
 0x1e7   : > { %v1715_v13 = vadd.f32 %v1714_v12, %v1675_v2 }
 0x1e9   : > { %v1726_v20 = vadd.f32 %v3716_v55, %v1715_v13  ;;  %v684_v13 = vld [vmem:[%s4286_s6 + $0xd0] sm:$0xff] }
 0x1eb   : > { %v1743_v39 = vsel %vm1727_vm11, %v1726_v20, -inf }
 0x1ec   : > { %1732 = vmax.xlane.f32.xlu2 %v1731_v21  ;;  %1744 = vmax.xlane.f32.xlu0 %v1743_v39  ;;  %v678_v21 = vld [vmem:[%s4286_s6 + $0xa0] sm:$0xff]  ;;  %v683_v39 = vld [vmem:[%s4286_s6 + $0xc8] sm:$0xff] }
 0x200   : > { %2976 = vrot.lane.b32.xlu0 %v2975_v62, %s3013_s27 }
 0x240   : > { %v1730_v29 = vpop.xlane.xlu1 %1729 }
 0x241   : > { %v1746_v10 = vsub.f32 %v3729_v7, %v1730_v29  ;;  %v699_v29 = vld [vmem:[%s4286_s6 + $0x148] sm:$0xff] }
 0x243   : > { %v1752_v4 = vmul.f32 1.442695, %v1746_v10  ;;  %v677_v10 = vld [vmem:[%s4286_s6 + $0x98] sm:$0xff] }
 0x245   : > { %2981 = vpow2.f32 %v1752_v4  ;;  %v676_v4 = vld [vmem:[%s4286_s6 + $0x90] sm:$0xff] }
 0x24b   : > { %v3774_v37 = vpop.eup %2981 }
 0x24c   : > { %v1764_v40 = vsel %vm1727_vm11, %v3774_v37, 0.0 }
 0x24d   : > { %1765 = vadd.xlane.f32.xlu1 %v1764_v40  ;;  %v697_v40 = vld [vmem:[%s4286_s6 + $0x138] sm:$0xff] }
 0x24f   : > { %v1739_v30 = vpop.xlane.xlu0 %1738 }
 0x250   : > { %v1749_v31 = vsub.f32 %v1724_v27, %v1739_v30  ;;  %v1736_v62 = vpop.xlane.xlu1 %1735 }
 0x251   : > { %v1748_v42 = vsub.f32 %v1723_v16, %v1736_v62 }
 0x252   : > { %v1758_v55 = vmul.f32 1.442695, %v1749_v31 }
 0x253   : > { %v1756_v46 = vmul.f32 1.442695, %v1748_v42 }
 0x254   : > { %2983 = vpow2.f32 %v1758_v55  ;;  %v682_v55 = vld [vmem:[%s4286_s6 + $0xc0] sm:$0xff] }
 0x257   : > { %v1742_v35 = vpop.xlane.xlu2 %1741 }
 0x258   : > { %v1750_v23 = vsub.f32 %v1725_v8, %v1742_v35  ;;  %v686_v8 = vld [vmem:[%s4286_s6 + $0xe0] sm:$0xff] }
 0x259   : > { %2223 = vmatpush.msra.mxu3 %v686_v8  ;;  %v698_v35 = vld [vmem:[%s4286_s6 + $0x140] sm:$0xff] }
 0x25a   : > { %v3778_v47 = vpop.eup %2983  ;;  %v1760_v59 = vmul.f32 1.442695, %v1750_v23 }
 0x25b   : > { %v1773_v60 = vsel %vm1727_vm11, %v3778_v47, 0.0  ;;  %2224 = vmatpush.msra.mxu3 %v685_v34 }
 0x25c   : > { %2985 = vpow2.f32 %v1760_v59  ;;  %1774 = vadd.xlane.f32.xlu2 %v1773_v60  ;;  %v696_v60 = vld [vmem:[%s4286_s6 + $0x130] sm:$0xff] }
 0x25f   : > { %v1733_v7 = vpop.xlane.xlu2 %1732  ;;  %v1745_v27 = vpop.xlane.xlu0 %1744 }
 0x260   : > { %v1747_v41 = vsub.f32 %v1722_v19, %v1733_v7  ;;  %v1751_v36 = vsub.f32 %v1726_v20, %v1745_v27  ;;  %v695_v27 = vld [vmem:[%s4286_s6 + $0x128] sm:$0xff] }
 0x262   : > { %v3782_v48 = vpop.eup %2985  ;;  %v1754_v54 = vmul.f32 1.442695, %v1747_v41  ;;  %v1762_v44 = vmul.f32 1.442695, %v1751_v36  ;;  %v663_v36 = vld [vmem:[%s4286_s6 + $0x28] sm:$0xff] }
 0x263   : > { %v1776_v25 = vsel %vm1727_vm11, %v3782_v48, 0.0 }
 0x264   : > { %2987 = vpow2.f32 %v1754_v54  ;;  %1777 = vadd.xlane.f32.xlu2 %v1776_v25  ;;  %v694_v54 = vld [vmem:[%s4286_s6 + $0x120] sm:$0xff] }
 0x265   : > { %2989 = vpow2.f32 %v1762_v44 }
 0x266   : > { %2991 = vpow2.f32 %v1756_v46  ;;  %577 = vrot.lane.b32.xlu1 %v3668_v61, %s3013_s27  ;;  %v658_v61 = vld [vmem:[%s4286_s6] sm:$0xff] }
 0x267   : > { %2017 = vmatpush.msrb.mxu2 %v658_v61  ;;  %v662_v46 = vld [vmem:[%s4286_s6 + $0x20] sm:$0xff] }
 0x269   : > { %2107 = vmatpush.msra.mxu2 %v672_v53  ;;  %v669_v53 = vld [vmem:[%s4286_s6 + $0x58] sm:$0xff] }
 0x26a   : > { %v3786_v49 = vpop.eup %2987 }
 0x26b   : > { %v3788_v0 = vpop.eup %2989  ;;  %v1767_v58 = vsel %vm1727_vm11, %v3786_v49, 0.0  ;;  %2108 = vmatpush.msra.mxu2 %v671_v56 }
 0x26c   : > { %1768 = vadd.xlane.f32.xlu2 %v1767_v58  ;;  %v1779_v52 = vsel %vm1727_vm11, %v3788_v0, 0.0  ;;  %v3794_v50 = vpop.eup %2991 }
 0x26d   : > { %1780 = vadd.xlane.f32.xlu0 %v1779_v52  ;;  %v1770_v51 = vsel %vm1727_vm11, %v3794_v50, 0.0  ;;  %2109 = vmatpush.msra.mxu2 %v670_v57  ;;  %v706_v57 = vld [vmem:[%s4286_s6 + $0x180] sm:$0xff] }
 0x272   : > { %v2977_v24 = vpop.permute.xlu0 %2976 }
 0x273   : > { %v2978_v3 = vunpack.i.l.bf16 %v2977_v24  ;;  %v2979_v17 = vunpack.i.h.bf16 %v2977_v24  ;;  %v708_v24 = vld [vmem:[%s4286_s6 + $0x190] sm:$0xff] }
 0x274   : > { %1771 = vadd.xlane.f32.xlu2 %v1770_v51 }
 0x275   : > { %1851 = vmatpush.msrb.mxu1 %v2978_v3  ;;  %v711_v3 = vld [vmem:[%s4286_s6 + $0x1a8] sm:$0xff] }
 0x277   : > { %1852 = vmatpush.msrb.mxu1 %v2979_v17 }
 0x2c0   : > { %v1766_v18 = vpop.xlane.xlu1 %1765 }
 0x2c1   : > { %2993 = vrcp.f32 %v1766_v18  ;;  %v709_v18 = vld [vmem:[%s4286_s6 + $0x198] sm:$0xff] }
 0x2c7   : > { %v2994_v38 = vpop.eup %2993 }
 0x2c8   : > { %v3843_v43 = vmul.f32 %v2994_v38, %v3774_v37 }
 0x2ca   : > { %2932 = vmatmul.msk.f32.vlgmr.msra.gmra.mxu0 %vm1727_vm11, %v3843_v43  ;;  %v1868_v19 = vrot.slane %v3843_v43, 5  ;;  %v1867_v59 = vrot.slane %v3843_v43, 4 }
 0x2cb   : > { %2153 = vmatpush.msra.mxu0 %v678_v21  ;;  %v718_v21 = vld [vmem:[%s4286_s6 + $0x1e0] sm:$0xff] }
 0x2cd   : > { %2154 = vmatpush.msra.mxu0 %v677_v10  ;;  %v690_v10 = vld [vmem:[%s4286_s6 + $0x100] sm:$0xff] }
 0x2cf   : > { %v1775_v45 = vpop.xlane.xlu2 %1774  ;;  %2155 = vmatpush.msra.mxu0 %v676_v4 }
 0x2d0   : > { %2995 = vrcp.f32 %v1775_v45  ;;  %v668_v45 = vld [vmem:[%s4286_s6 + $0x50] sm:$0xff] }
 0x2d6   : > { %v2996_v26 = vpop.eup %2995 }
 0x2d7   : > { %v3849_v33 = vmul.f32 %v2996_v26, %v3778_v47  ;;  %v1778_v1 = vpop.xlane.xlu2 %1777  ;;  %v723_v26 = vld [vmem:[%s4286_s6 + $0x208] sm:$0xff] }
 0x2d8   : > { %2997 = vrcp.f32 %v1778_v1  ;;  %v578_v41 = vpop.permute.xlu1 %577 }
 0x2d9   : > { %v1927_v2 = vperm.slane %v3849_v33, 0  ;;  %v1910_v12 = vrot.slane %v3849_v33, 5  ;;  %v1909_v20 = vrot.slane %v3849_v33, 4  ;;  %1853 = vmatpush.msrb.mxu1 %v578_v41  ;;  %v1907_v22 = vrot.slane %v3849_v33, 2  ;;  %v681_v41 = vld [vmem:[%s4286_s6 + $0xb8] sm:$0xff] }
 0x2da   : > { %2935 = vmatmul.msk.f32.vlgmr.msrb.gmra.mxu1 %vm1727_vm11, %v3849_v33  ;;  %v1911_v4 = vrot.slane %v3849_v33, 6 }
 0x2db   : > { %v1975_v16 = vsel %vm540_vm2, %v3843_v43, %v1927_v2  ;;  %v1932_v9 = vperm.slane %v1910_v12, 0  ;;  %v1931_v23 = vperm.slane %v1909_v20, 0  ;;  %2038 = vmatpush.msra.mxu1 %v663_v36  ;;  %v667_v2 = vld [vmem:[%s4286_s6 + $0x48] sm:$0xff]  ;;  %v1929_v12 = vperm.slane %v1907_v22, 0 }
 0x2dc   : > { %2938 = vmatmul.msk.f32.vlgmr.msrb.gmra.mxu2 %vm1727_vm11, %v1975_v16  ;;  %v1906_v20 = vrot.slane %v3849_v33, 1  ;;  %v691_v22 = vld [vmem:[%s4286_s6 + $0x108] sm:$0xff] }
 0x2dd   : > { %v1980_v30 = vsel %vm540_vm2, %v1868_v19, %v1932_v9  ;;  %2199 = vmatpush.msrb.mxu2 %v684_v13  ;;  %v1979_v62 = vsel %vm540_vm2, %v1867_v59, %v1931_v23  ;;  %2039 = vmatpush.msra.mxu1 %v662_v46  ;;  %v719_v13 = vld [vmem:[%s4286_s6 + $0x1e8] sm:$0xff]  ;;  %v722_v19 = vld [vmem:[%s4286_s6 + $0x200] sm:$0xff]  ;;  %v1865_v9 = vrot.slane %v3843_v43, 2  ;;  %v1864_v59 = vrot.slane %v3843_v43, 1 }
 0x2de   : > { %v2998_v31 = vpop.eup %2997  ;;  %2943 = vmatmul.msk.f32.vlgmr.msrb.gmra.mxu3 %vm1727_vm11, %v1980_v30  ;;  %v702_v46 = vld [vmem:[%s4286_s6 + $0x160] sm:$0xff] }
 0x2df   : > { %v1769_v37 = vpop.xlane.xlu2 %1768  ;;  %2200 = vmatpush.msrb.mxu2 %v683_v39  ;;  %2314 = vmatpush.msrb.mxu3 %v699_v29  ;;  %v3890_v47 = vmul.f32 %v2998_v31, %v3782_v48  ;;  %v721_v29 = vld [vmem:[%s4286_s6 + $0x1f8] sm:$0xff]  ;;  %v1977_v30 = vsel %vm540_vm2, %v1865_v9, %v1929_v12 }
 0x2e0   : > { %2999 = vrcp.f32 %v1769_v37  ;;  %v1781_v7 = vpop.xlane.xlu0 %1780  ;;  %2040 = vmatpush.msra.mxu1 %v661_v15  ;;  %v689_v37 = vld [vmem:[%s4286_s6 + $0xf8] sm:$0xff]  ;;  %v679_v15 = vld [vmem:[%s4286_s6 + $0xa8] sm:$0xff] }
 0x2e1   : > { %2201 = vmatpush.msrb.mxu2 %v682_v55  ;;  %2315 = vmatpush.msrb.mxu3 %v698_v35  ;;  %v1913_v48 = vrot.slane %v3890_v47, 1  ;;  %3001 = vrcp.f32 %v1781_v7  ;;  %v1935_v58 = vperm.slane %v3890_v47, 0  ;;  %v1916_v61 = vrot.slane %v3890_v47, 4  ;;  %v725_v9 = vld [vmem:[%s4286_s6 + $0x218] sm:$0xff] }
 0x2e2   : > { %v1917_v6 = vrot.slane %v3890_v47, 5  ;;  %2936 = vmatmul.msk.f32.gmra.mxu1 %vm1727_vm11, %v3890_v47  ;;  %v1928_v35 = vperm.slane %v1906_v20, 0  ;;  %v703_v20 = vld [vmem:[%s4286_s6 + $0x168] sm:$0xff] }
 0x2e3   : > { %2316 = vmatpush.msrb.mxu3 %v697_v40  ;;  %v1936_v52 = vperm.slane %v1913_v48, 0  ;;  %2084 = vmatpush.msrb.mxu1 %v669_v53  ;;  %v1939_v38 = vperm.slane %v1916_v61, 0  ;;  %v1869_v48 = vrot.slane %v3843_v43, 6  ;;  %v1866_v61 = vrot.slane %v3843_v43, 3  ;;  %v693_v53 = vld [vmem:[%s4286_s6 + $0x118] sm:$0xff] }
 0x2e4   : > { %2942 = vmatmul.msk.f32.vlgmr.msra.gmra.mxu2 %vm1727_vm11, %v1979_v62  ;;  %v1940_v63 = vperm.slane %v1917_v6, 0  ;;  %v688_v62 = vld [vmem:[%s4286_s6 + $0xf0] sm:$0xff]  ;;  %v1976_v36 = vsel %vm540_vm2, %v1864_v59, %v1928_v35 }
 0x2e5   : > { %2291 = vmatpush.msra.mxu2 %v696_v60  ;;  %2085 = vmatpush.msrb.mxu1 %v668_v45  ;;  %v1933_v60 = vperm.slane %v1911_v4, 0  ;;  %v717_v4 = vld [vmem:[%s4286_s6 + $0x1d8] sm:$0xff]  ;;  %v716_v35 = vld [vmem:[%s4286_s6 + $0x1d0] sm:$0xff] }
 0x2e6   : > { %v3000_v42 = vpop.eup %2999 }
 0x2e7   : > { %v3909_v44 = vmul.f32 %v3000_v42, %v3786_v49  ;;  %v1772_v25 = vpop.xlane.xlu2 %1771  ;;  %2292 = vmatpush.msra.mxu2 %v695_v27  ;;  %v3002_v14 = vpop.eup %3001  ;;  %2086 = vmatpush.msrb.mxu1 %v667_v2  ;;  %v1908_v42 = vrot.slane %v3849_v33, 3 }
 0x2e8   : > { %3003 = vrcp.f32 %v1772_v25 }
 0x2e9   : > { %2933 = vmatmul.msk.f32.gmra.mxu0 %vm1727_vm11, %v3909_v44  ;;  %v1871_v49 = vrot.slane %v3909_v44, 1  ;;  %2293 = vmatpush.msra.mxu2 %v694_v54  ;;  %v1983_v51 = vsel %vm540_vm2, %v3909_v44, %v1935_v58  ;;  %v1874_v8 = vrot.slane %v3909_v44, 4  ;;  %v1875_v34 = vrot.slane %v3909_v44, 5  ;;  %v680_v58 = vld [vmem:[%s4286_s6 + $0xb0] sm:$0xff] }
 0x2ea   : > { %v1872_v6 = vrot.slane %v3909_v44, 2  ;;  %v1877_v59 = vrot.slane %v3909_v44, 7 }
 0x2eb   : > { %v1984_v17 = vsel %vm540_vm2, %v1871_v49, %v1936_v52  ;;  %v1987_v1 = vsel %vm540_vm2, %v1874_v8, %v1939_v38  ;;  %v1981_v49 = vsel %vm540_vm2, %v1869_v48, %v1933_v60  ;;  %v1912_v8 = vrot.slane %v3849_v33, 7  ;;  %v713_v33 = vld [vmem:[%s4286_s6 + $0x1b8] sm:$0xff] }
 0x2ec   : > { %2946 = vmatmul.msk.f32.vlgmr.msrb.gmra.mxu2 %vm1727_vm11, %v1983_v51  ;;  %2947 = vmatmul.msk.f32.vlgmr.msra.gmra.mxu3 %vm1727_vm11, %v1984_v17  ;;  %v1914_v51 = vrot.slane %v3890_v47, 2  ;;  %v701_v17 = vld [vmem:[%s4286_s6 + $0x158] sm:$0xff] }
 0x2ed   : > { %2383 = vmatpush.msrb.mxu2 %v708_v24  ;;  %2406 = vmatpush.msra.mxu3 %v711_v3  ;;  %v1930_v3 = vperm.slane %v1908_v42, 0  ;;  %v1934_v38 = vperm.slane %v1912_v8, 0  ;;  %v727_v42 = vld [vmem:[%s4286_s6 + $0x228] sm:$0xff] }
 0x2ee   : > { %v3004_v56 = vpop.eup %3003 }
 0x2ef   : > { %v3949_v28 = vmul.f32 %v3004_v56, %v3794_v50  ;;  %2384 = vmatpush.msrb.mxu2 %v707_v5  ;;  %2407 = vmatpush.msra.mxu3 %v710_v32  ;;  %v3963_v50 = vmul.f32 %v3002_v14, %v3788_v0  ;;  %v1988_v0 = vsel %vm540_vm2, %v1875_v34, %v1940_v63  ;;  %v700_v32 = vld [vmem:[%s4286_s6 + $0x150] sm:$0xff]  ;;  %v714_v34 = vld [vmem:[%s4286_s6 + $0x1c0] sm:$0xff]  ;;  %v1918_v63 = vrot.slane %v3890_v47, 6 }
 0x2f0   : > { %v1978_v56 = vsel %vm540_vm2, %v1866_v61, %v1930_v3 }
 0x2f1   : > { %2934 = vmatmul.msk.f32.gmra.mxu0 %vm1727_vm11, %v3949_v28  ;;  %2385 = vmatpush.msrb.mxu2 %v706_v57  ;;  %v1920_v16 = vrot.slane %v3963_v50, 1  ;;  %v1878_v39 = vrot.slane %v3949_v28, 1  ;;  %v1943_v31 = vperm.slane %v3963_v50, 0  ;;  %v1923_v7 = vrot.slane %v3963_v50, 4 }
 0x2f2   : > { %2408 = vmatpush.msra.mxu3 %v709_v18  ;;  %2937 = vmatmul.msk.f32.gmra.mxu1 %vm1727_vm11, %v3963_v50  ;;  %v1924_v27 = vrot.slane %v3963_v50, 5  ;;  %v1881_v54 = vrot.slane %v3949_v28, 4  ;;  %v1882_v25 = vrot.slane %v3949_v28, 5  ;;  %v1937_v57 = vperm.slane %v1914_v51, 0  ;;  %v692_v18 = vld [vmem:[%s4286_s6 + $0x110] sm:$0xff] }
 0x2f3   : > { %v1944_v55 = vperm.slane %v1920_v16, 0  ;;  %v1991_v23 = vsel %vm540_vm2, %v3949_v28, %v1943_v31  ;;  %v1947_v52 = vperm.slane %v1923_v7, 0  ;;  %v1941_v12 = vperm.slane %v1918_v63, 0 }
 0x2f4   : > { %2950 = vmatmul.msk.f32.vlgmr.msra.gmra.mxu2 %vm1727_vm11, %v1987_v1  ;;  %2951 = vmatmul.msk.f32.vlgmr.msrb.gmra.mxu3 %vm1727_vm11, %v1988_v0  ;;  %v1948_v24 = vperm.slane %v1924_v27, 0  ;;  %v1985_v45 = vsel %vm540_vm2, %v1872_v6, %v1937_v57  ;;  %v1876_v1 = vrot.slane %v3909_v44, 6  ;;  %v705_v0 = vld [vmem:[%s4286_s6 + $0x178] sm:$0xff]  ;;  %v1925_v60 = vrot.slane %v3963_v50, 6 }
 0x2f5   : > { %2475 = vmatpush.msra.mxu2 %v720_v11  ;;  %2498 = vmatpush.msrb.mxu3 %v723_v26  ;;  %v1992_v40 = vsel %vm540_vm2, %v1878_v39, %v1944_v55  ;;  %v1995_v5 = vsel %vm540_vm2, %v1881_v54, %v1947_v52  ;;  %v712_v11 = vld [vmem:[%s4286_s6 + $0x1b0] sm:$0xff]  ;;  %v1870_v26 = vrot.slane %v3843_v43, 7  ;;  %v1921_v39 = vrot.slane %v3963_v50, 2 }
 0x2f6   : > { %v1996_v14 = vsel %vm540_vm2, %v1882_v25, %v1948_v24  ;;  %v704_v43 = vld [vmem:[%s4286_s6 + $0x170] sm:$0xff]  ;;  %v1989_v16 = vsel %vm540_vm2, %v1876_v1, %v1941_v12  ;;  %v1883_v7 = vrot.slane %v3949_v28, 6  ;;  %v1922_v48 = vrot.slane %v3963_v50, 3 }
 0x2f7   : > { %2476 = vmatpush.msra.mxu2 %v719_v13  ;;  %2499 = vmatpush.msrb.mxu3 %v722_v19  ;;  %v1982_v2 = vsel %vm540_vm2, %v1870_v26, %v1934_v38  ;;  %v726_v13 = vld [vmem:[%s4286_s6 + $0x220] sm:$0xff]  ;;  %v1915_v19 = vrot.slane %v3890_v47, 3  ;;  %v1945_v55 = vperm.slane %v1921_v39, 0  ;;  %v1880_v54 = vrot.slane %v3949_v28, 3 }
 0x2f8   : > { %v1946_v25 = vperm.slane %v1922_v48, 0 }
 0x2f9   : > { %2940 = vmatmul.msk.f32.vlgmr.msrb.gmra.mxu0 %vm1727_vm11, %v1977_v30  ;;  %2477 = vmatpush.msra.mxu2 %v718_v21  ;;  %v1873_v21 = vrot.slane %v3909_v44, 3  ;;  %v1879_v30 = vrot.slane %v3949_v28, 2  ;;  %v728_v44 = vld [vmem:[%s4286_s6 + $0x230] sm:$0xff] }
 0x2fa   : > { %2500 = vmatpush.msrb.mxu3 %v721_v29  ;;  %2245 = vmatpush.msrb.mxu0 %v690_v10  ;;  %v724_v29 = vld [vmem:[%s4286_s6 + $0x210] sm:$0xff]  ;;  %v1938_v10 = vperm.slane %v1915_v19, 0 }
 0x2fb   : > { %2939 = vmatmul.msk.f32.vlgmr.msra.gmra.mxu1 %vm1727_vm11, %v1976_v36 }
 0x2fc   : > { %2954 = vmatmul.msk.f32.vlgmr.msrb.gmra.mxu2 %vm1727_vm11, %v1991_v23  ;;  %2955 = vmatmul.msk.f32.vlgmr.msra.gmra.mxu3 %vm1727_vm11, %v1992_v40  ;;  %v1986_v31 = vsel %vm540_vm2, %v1873_v21, %v1938_v10  ;;  %v1919_v23 = vrot.slane %v3890_v47, 7  ;;  %v715_v40 = vld [vmem:[%s4286_s6 + $0x1c8] sm:$0xff]  ;;  %v729_v47 = vld [vmem:[%s4286_s6 + $0x238] sm:$0xff] }
 0x2fd   : > { %2246 = vmatpush.msrb.mxu0 %v689_v37  ;;  %2176 = vmatpush.msra.mxu1 %v681_v41  ;;  %v1993_v37 = vsel %vm540_vm2, %v1879_v30, %v1945_v55  ;;  %v1949_v41 = vperm.slane %v1925_v60, 0 }
 0x2ff   : > { %2247 = vmatpush.msrb.mxu0 %v688_v62  ;;  %2177 = vmatpush.msra.mxu1 %v680_v58  ;;  %v1942_v62 = vperm.slane %v1919_v23, 0  ;;  %v1997_v36 = vsel %vm540_vm2, %v1883_v7, %v1949_v41  ;;  %v1926_v58 = vrot.slane %v3963_v50, 7 }
 0x301   : > { %2944 = vmatmul.msk.f32.vlgmr.msra.gmra.mxu0 %vm1727_vm11, %v1981_v49  ;;  %2178 = vmatpush.msra.mxu1 %v679_v15  ;;  %v1990_v27 = vsel %vm540_vm2, %v1877_v59, %v1942_v62  ;;  %v1884_v49 = vrot.slane %v3949_v28, 7  ;;  %v1950_v52 = vperm.slane %v1926_v58, 0  ;;  %v2701_v58 = vld [vmem:[%s4283_s3 + $0x78] sm:$0xff] }
 0x302   : > { %2337 = vmatpush.msra.mxu0 %v702_v46  ;;  %v1994_v46 = vsel %vm540_vm2, %v1880_v54, %v1946_v25  ;;  %2706 = vmatpush.msrb.mxu2 %v2701_v58 }
 0x303   : > { %2941 = vmatmul.msk.f32.vlgmr.msrb.gmra.mxu1 %vm1727_vm11, %v1978_v56  ;;  %v1998_v24 = vsel %vm540_vm2, %v1884_v49, %v1950_v52  ;;  %v2700_v49 = vld [vmem:[%s4283_s3 + $0x70] sm:$0xff] }
 0x304   : > { %2958 = vmatmul.msk.f32.vlgmr.msra.gmra.mxu2 %vm1727_vm11, %v1995_v5  ;;  %2959 = vmatmul.msk.f32.vlgmr.msrb.gmra.mxu3 %vm1727_vm11, %v1996_v14 }
 0x305   : > { %2338 = vmatpush.msra.mxu0 %v701_v17  ;;  %2268 = vmatpush.msrb.mxu1 %v693_v53 }
 0x306   : > { %2707 = vmatpush.msrb.mxu2 %v2700_v49 }
 0x307   : > { %2339 = vmatpush.msra.mxu0 %v700_v32  ;;  %2269 = vmatpush.msrb.mxu1 %v692_v18 }
 0x309   : > { %2948 = vmatmul.msk.f32.vlgmr.msrb.gmra.mxu0 %vm1727_vm11, %v1985_v45  ;;  %2270 = vmatpush.msrb.mxu1 %v691_v22 }
 0x30a   : > { %2429 = vmatpush.msrb.mxu0 %v714_v34 }
 0x30b   : > { %2945 = vmatmul.msk.f32.vlgmr.msra.gmra.mxu1 %vm1727_vm11, %v1982_v2 }
 0x30c   : > { %2430 = vmatpush.msrb.mxu0 %v713_v33  ;;  %2360 = vmatpush.msra.mxu1 %v705_v0 }
 0x30e   : > { %2431 = vmatpush.msrb.mxu0 %v712_v11  ;;  %2361 = vmatpush.msra.mxu1 %v704_v43 }
 0x310   : > { %2362 = vmatpush.msra.mxu1 %v703_v20 }
 0x311   : > { %2952 = vmatmul.msk.f32.vlgmr.msra.gmra.mxu0 %vm1727_vm11, %v1989_v16 }
 0x312   : > { %2521 = vmatpush.msra.mxu0 %v726_v13 }
 0x313   : > { %2949 = vmatmul.msk.f32.vlgmr.msrb.gmra.mxu1 %vm1727_vm11, %v1986_v31 }
 0x314   : > { %2522 = vmatpush.msra.mxu0 %v725_v9  ;;  %2452 = vmatpush.msrb.mxu1 %v717_v4 }
 0x316   : > { %2523 = vmatpush.msra.mxu0 %v724_v29  ;;  %2453 = vmatpush.msrb.mxu1 %v716_v35 }
 0x318   : > { %2454 = vmatpush.msrb.mxu1 %v715_v40 }
 0x319   : > { %2956 = vmatmul.msk.f32.vlgmr.msrb.gmra.mxu0 %vm1727_vm11, %v1993_v37 }
 0x31b   : > { %2953 = vmatmul.msk.f32.vlgmr.msra.gmra.mxu1 %vm1727_vm11, %v1990_v27 }
 0x31c   : > { %2544 = vmatpush.msra.mxu1 %v729_v47 }
 0x31e   : > { %2545 = vmatpush.msra.mxu1 %v728_v44 }
 0x320   : > { %2546 = vmatpush.msra.mxu1 %v727_v42 }
 0x321   : > { %2960 = vmatmul.msk.f32.vlgmr.msra.gmra.mxu0 %vm1727_vm11, %v1997_v36 }
 0x323   : > { %2957 = vmatmul.msk.f32.vlgmr.msrb.gmra.mxu1 %vm1727_vm11, %v1994_v46 }
 0x32b   : > { %2961 = vmatmul.msk.f32.vlgmr.msra.gmra.mxu1 %vm1727_vm11, %v1998_v24  ;;  %v2699_v24 = vld [vmem:[%s4283_s3 + $0x68] sm:$0xff] }
 0x32c   : > { %2708 = vmatpush.msrb.mxu2 %v2699_v24 }
 0x347   : > { %v1820_v3 = vpop.f32.mrf.mxu0 }
 0x357   : > { %v1855_v17 = vpop.f32.mrf.mxu1 }
 0x35f   : > { %v2019_v51 = vpop.f32.mrf.mxu2  ;;  %v4144_v61 = vpop.f32.mrf.mxu1 }
 0x360   : > { %v2623_v1 = vrot.slane %v2019_v51, 1 }
 0x361   : > { %v2134_v5 = vpop.f32.mrf.mxu3 }
 0x362   : > { %v2583_v4 = vrot.slane %v2134_v5, 3  ;;  %v2631_v35 = vrot.slane %v2134_v5, 4 }
 0x366   : > { %v4142_v15 = vpop.f32.mrf.mxu0 }
 0x367   : > { %v2111_v14 = vpop.f32.mrf.mxu2 }
 0x368   : > { %v2581_v9 = vrot.slane %v2111_v14, 4  ;;  %v2629_v20 = vrot.slane %v2111_v14, 5 }
 0x36e   : > { %v4146_v6 = vpop.f32.mrf.mxu0 }
 0x36f   : > { %v2203_v32 = vpop.f32.mrf.mxu2  ;;  %v2226_v50 = vpop.f32.mrf.mxu3 }
 0x370   : > { %v2589_v53 = vrot.slane %v2226_v50, 7  ;;  %v4149_v56 = vpop.f32.mrf.mxu1  ;;  %v2637_v25 = vrot.slane %v2203_v32, 1 }
 0x372   : > { %v2590_v28 = vsel %vm1548_vm3, %v2589_v53, %v2203_v32 }
 0x376   : > { %v2065_v57 = vpop.f32.mrf.mxu0 }
 0x377   : > { %v4151_v8 = vpop.f32.mrf.mxu2  ;;  %v4153_v34 = vpop.f32.mrf.mxu3  ;;  %v2577_v33 = vrot.slane %v2065_v57, 6  ;;  %v2625_v13 = vrot.slane %v2065_v57, 7 }
 0x378   : > { %v2042_v18 = vpop.f32.mrf.mxu1  ;;  %v2595_v5 = vrot.slane %v4151_v8, 4  ;;  %v2643_v14 = vrot.slane %v4151_v8, 5  ;;  %v2597_v57 = vrot.slane %v4153_v34, 3 }
 0x379   : > { %v2575_v45 = vrot.slane %v2042_v18, 7  ;;  %v2624_v12 = vsel %vm1548_vm3, %v2042_v18, %v2623_v1 }
 0x37a   : > { %v2626_v21 = vsel %vm1551_vm4, %v2625_v13, %v2624_v12  ;;  %v2696_v12 = vld [vmem:[%s4283_s3 + $0x50] sm:$0xff] }
 0x37b   : > { %v2576_v38 = vsel %vm1548_vm3, %v2575_v45, %v2019_v51 }
 0x37c   : > { %v2578_v26 = vsel %vm1551_vm4, %v2577_v33, %v2576_v38  ;;  %v2697_v38 = vld [vmem:[%s4283_s3 + $0x58] sm:$0xff] }
 0x37e   : > { %v2157_v22 = vpop.f32.mrf.mxu0 }
 0x37f   : > { %v4156_v63 = vpop.f32.mrf.mxu3  ;;  %v4160_v0 = vpop.f32.mrf.mxu2  ;;  %v2585_v37 = vrot.slane %v2157_v22, 2  ;;  %v2633_v62 = vrot.slane %v2157_v22, 3 }
 0x380   : > { %v2603_v11 = vrot.slane %v4156_v63, 7  ;;  %v2088_v43 = vpop.f32.mrf.mxu1 }
 0x381   : > { %v2579_v16 = vrot.slane %v2088_v43, 5  ;;  %v2627_v19 = vrot.slane %v2088_v43, 6 }
 0x382   : > { %v2604_v2 = vsel %vm1548_vm3, %v2603_v11, %v4160_v0  ;;  %v2645_v11 = vrot.slane %v4153_v34, 4  ;;  %v2695_v34 = vld [vmem:[%s4283_s3 + $0x48] sm:$0xff] }
 0x383   : > { %v2580_v29 = vsel %vm1554_vm5, %v2579_v16, %v2578_v26  ;;  %v2628_v10 = vsel %vm1554_vm5, %v2627_v19, %v2626_v21  ;;  %v2694_v21 = vld [vmem:[%s4283_s3 + $0x40] sm:$0xff] }
 0x384   : > { %v2582_v31 = vsel %vm1557_vm6, %v2581_v9, %v2580_v29  ;;  %v2630_v55 = vsel %vm1557_vm6, %v2629_v20, %v2628_v10 }
 0x385   : > { %v2584_v40 = vsel %vm1560_vm7, %v2583_v4, %v2582_v31  ;;  %v2632_v60 = vsel %vm1560_vm7, %v2631_v35, %v2630_v55  ;;  %v2651_v31 = vrot.slane %v4160_v0, 1  ;;  %v2692_v35 = vld [vmem:[%s4283_s3 + $0x30] sm:$0xff] }
 0x386   : > { %v2249_v39 = vpop.f32.mrf.mxu0  ;;  %v2586_v59 = vsel %vm1563_vm8, %v2585_v37, %v2584_v40  ;;  %v2634_v44 = vsel %vm1563_vm8, %v2633_v62, %v2632_v60  ;;  %v2691_v40 = vld [vmem:[%s4283_s3 + $0x28] sm:$0xff] }
 0x387   : > { %v2591_v30 = vrot.slane %v2249_v39, 6  ;;  %v2639_v46 = vrot.slane %v2249_v39, 7  ;;  %v2479_v37 = vpop.f32.mrf.mxu2 }
 0x388   : > { %v2180_v7 = vpop.f32.mrf.mxu1  ;;  %v2609_v62 = vrot.slane %v2479_v37, 4 }
 0x389   : > { %v2592_v23 = vsel %vm1551_vm4, %v2591_v30, %v2590_v28  ;;  %v2587_v47 = vrot.slane %v2180_v7, 1  ;;  %v2635_v27 = vrot.slane %v2180_v7, 2  ;;  %v2698_v28 = vld [vmem:[%s4283_s3 + $0x60] sm:$0xff]  ;;  %v2693_v30 = vld [vmem:[%s4283_s3 + $0x38] sm:$0xff]  ;;  %v2657_v7 = vrot.slane %v2479_v37, 5 }
 0x38a   : > { %2709 = vmatpush.msrb.mxu2 %v2698_v28 }
 0x38b   : > { %v2588_v36 = vsel %vm1565_vm9, %v2587_v47, %v2586_v59  ;;  %v2636_v48 = vsel %vm1565_vm9, %v2635_v27, %v2634_v44  ;;  %v2690_v27 = vld [vmem:[%s4283_s3 + $0x20] sm:$0xff] }
 0x38c   : > { %v2668_v42 = vadd.f32 %v2636_v48, %v1855_v17  ;;  %v4177_v54 = vadd.f32 %v2588_v36, %v1820_v3  ;;  %v2638_v3 = vsel %vm1548_vm3, %v2226_v50, %v2637_v25  ;;  %2710 = vmatpush.msrb.mxu2 %v2697_v38  ;;  %v2689_v25 = vld [vmem:[%s4283_s3 + $0x18] sm:$0xff] }
 0x38d   : > { %v2640_v32 = vsel %vm1551_vm4, %v2639_v46, %v2638_v3 }
 0x38e   : > { %v2341_v41 = vpop.f32.mrf.mxu0  ;;  %2674 = vrot.lane.b32.xlu2 %v2668_v42, %s3013_s27  ;;  %2711 = vmatpush.msrb.mxu2 %v2696_v12 }
 0x38f   : > { %v2599_v33 = vrot.slane %v2341_v41, 2  ;;  %v2647_v16 = vrot.slane %v2341_v41, 3 }
 0x390   : > { %v2272_v52 = vpop.f32.mrf.mxu1  ;;  %2712 = vmatpush.msrb.mxu2 %v2695_v34 }
 0x391   : > { %v2593_v51 = vrot.slane %v2272_v52, 5  ;;  %v2641_v17 = vrot.slane %v2272_v52, 6  ;;  %v2688_v52 = vld [vmem:[%s4283_s3 + $0x10] sm:$0xff] }
 0x392   : > { %2713 = vmatpush.msrb.mxu2 %v2694_v21 }
 0x393   : > { %v2594_v18 = vsel %vm1554_vm5, %v2593_v51, %v2592_v23  ;;  %v2642_v50 = vsel %vm1554_vm5, %v2641_v17, %v2640_v32  ;;  %v2502_v23 = vpop.f32.mrf.mxu3  ;;  %v2687_v17 = vld [vmem:[%s4283_s3 + $0x8] sm:$0xff] }
 0x394   : > { %v2596_v22 = vsel %vm1557_vm6, %v2595_v5, %v2594_v18  ;;  %v2644_v8 = vsel %vm1557_vm6, %v2643_v14, %v2642_v50  ;;  %2714 = vmatpush.msrb.mxu2 %v2693_v30  ;;  %v2611_v41 = vrot.slane %v2502_v23, 3  ;;  %v2659_v46 = vrot.slane %v2502_v23, 4  ;;  %v2686_v50 = vld [vmem:[%s4283_s3] sm:$0xff] }
 0x395   : > { %v2598_v1 = vsel %vm1560_vm7, %v2597_v57, %v2596_v22  ;;  %v2646_v43 = vsel %vm1560_vm7, %v2645_v11, %v2644_v8 }
 0x396   : > { %v2433_v53 = vpop.f32.mrf.mxu0  ;;  %v2600_v13 = vsel %vm1563_vm8, %v2599_v33, %v2598_v1  ;;  %v2648_v20 = vsel %vm1563_vm8, %v2647_v16, %v2646_v43  ;;  %2715 = vmatpush.msrb.mxu2 %v2692_v35 }
 0x397   : > { %v2605_v45 = vrot.slane %v2433_v53, 6  ;;  %v2653_v55 = vrot.slane %v2433_v53, 7 }
 0x398   : > { %v2364_v19 = vpop.f32.mrf.mxu1  ;;  %2716 = vmatpush.msrb.mxu2 %v2691_v40 }
 0x399   : > { %v2606_v26 = vsel %vm1551_vm4, %v2605_v45, %v2604_v2  ;;  %v2601_v9 = vrot.slane %v2364_v19, 1  ;;  %v2649_v2 = vrot.slane %v2364_v19, 2 }
 0x39a   : > { %2717 = vmatpush.msrb.mxu2 %v2690_v27 }
 0x39b   : > { %v2650_v39 = vsel %vm1565_vm9, %v2649_v2, %v2648_v20  ;;  %v2602_v29 = vsel %vm1565_vm9, %v2601_v9, %v2600_v13 }
 0x39c   : > { %v2669_v10 = vadd.f32 %v2650_v39, %v4144_v61  ;;  %v2621_v4 = vadd.f32 %v2602_v29, %v4142_v15  ;;  %v2652_v15 = vsel %vm1548_vm3, %v4156_v63, %v2651_v31  ;;  %2718 = vmatpush.msrb.mxu2 %v2689_v25 }
 0x39d   : > { %v2654_v47 = vsel %vm1551_vm4, %v2653_v55, %v2652_v15 }
 0x39e   : > { %2676 = vrot.lane.b32.xlu1 %v2669_v10, %s3013_s27  ;;  %v2525_v0 = vpop.f32.mrf.mxu0  ;;  %2719 = vmatpush.msrb.mxu2 %v2688_v52 }
 0x39f   : > { %v2613_v48 = vrot.slane %v2525_v0, 2  ;;  %v2661_v3 = vrot.slane %v2525_v0, 3 }
 0x3a0   : > { %v2456_v61 = vpop.f32.mrf.mxu1  ;;  %2720 = vmatpush.msrb.mxu2 %v2687_v17 }
 0x3a1   : > { %v2607_v59 = vrot.slane %v2456_v61, 5  ;;  %v2655_v60 = vrot.slane %v2456_v61, 6 }
 0x3a2   : > { %2721 = vmatpush.msrb.mxu2 %v2686_v50 }
 0x3a3   : > { %v2608_v44 = vsel %vm1554_vm5, %v2607_v59, %v2606_v26  ;;  %v2656_v36 = vsel %vm1554_vm5, %v2655_v60, %v2654_v47 }
 0x3a4   : > { %v2610_v63 = vsel %vm1557_vm6, %v2609_v62, %v2608_v44  ;;  %v2658_v42 = vsel %vm1557_vm6, %v2657_v7, %v2656_v36 }
 0x3a5   : > { %v2612_v58 = vsel %vm1560_vm7, %v2611_v41, %v2610_v63  ;;  %v2660_v24 = vsel %vm1560_vm7, %v2659_v46, %v2658_v42 }
 0x3a6   : > { %v2614_v49 = vsel %vm1563_vm8, %v2613_v48, %v2612_v58  ;;  %v2662_v32 = vsel %vm1563_vm8, %v2661_v3, %v2660_v24 }
 0x3a8   : > { %v2548_v51 = vpop.f32.mrf.mxu1 }
 0x3a9   : > { %v2615_v5 = vrot.slane %v2548_v51, 1  ;;  %v2663_v14 = vrot.slane %v2548_v51, 2 }
 0x3ab   : > { %v2616_v53 = vsel %vm1565_vm9, %v2615_v5, %v2614_v49  ;;  %v2664_v28 = vsel %vm1565_vm9, %v2663_v14, %v2662_v32 }
 0x3ac   : > { %v2670_v57 = vadd.f32 %v2664_v28, %v4149_v56  ;;  %v2622_v18 = vadd.f32 %v2616_v53, %v4146_v6  ;;  %v2980_v6 = vld [vmem:[%s4284_s4] ss:$0 sm:$0xff] }
 0x3ae   : > { %2678 = vrot.lane.b32.xlu1 %v2670_v57, %s3013_s27 }
 0x3e8   : > { %v2675_v45 = vpop.permute.xlu2 %2674 }
 0x3e9   : > { %v2683_v33 = vsel %vm730_vm1, %v4177_v54, %v2675_v45 }
 0x3ea   : > { %2722 = vmatmul.f32.vlgmr.msrb.gmra.mxu2 %v2683_v33 }
 0x410   : > { %v2677_v22 = vpop.permute.xlu1 %2676 }
 0x411   : > { %v2684_v8 = vsel %vm730_vm1, %v2621_v4, %v2677_v22 }
 0x412   : > { %2725 = vmatmul.f32.gmra.mxu2 %v2684_v8 }
 0x420   : > { %v2679_v38 = vpop.permute.xlu1 %2678 }
 0x421   : > { %v2685_v56 = vsel %vm730_vm1, %v2622_v18, %v2679_v38 }
 0x422   : > { %2728 = vmatmul.f32.gmra.mxu2 %v2685_v56 }
 0x46d   : > { %v2723_v11 = vpop.f32.mrf.mxu2 }
 0x46e   : > { %v2724_v54 = vadd.f32 %v2980_v6, %v2723_v11 }
 0x470   : > { %2732 = vst [vmem:[%s278_s13] sm:$0xff] %v2724_v54 }
 0x495   : > { %v2726_v26 = vpop.f32.mrf.mxu2 }
 0x496   : > { %v2727_v1 = vadd.f32 %v2980_v6, %v2726_v26 }
 0x498   : > { %2733 = vst [vmem:[%s278_s13 + $0x8] sm:$0xff] %v2727_v1 }
 0x4a5   : > { %v2729_v12 = vpop.f32.mrf.mxu2 }
 0x4a6   : > { %v2730_v13 = vadd.f32 %v2980_v6, %v2729_v12 }
 0x4a8   : > { %2734 = vst [vmem:[%s278_s13 + $0x10] sm:$0xff] %v2730_v13 }
 0x4a9 PF: > { %s17_s24 = sadd.s32 1, %s3011_s24  }
 0x4aa   : > { %p14_p4 = scmp.ge.s32.totalorder %s17_s24, 4  }
 0x4ac   :  { %16 = sbr.rel (!%p14_p4) target bundleno = 1 (0x1), region = 78 }

</bundles_post_ra>
